<compile_context>
chip_gen: v5e
topology: v5e:2x2
jax: 0.10.0
libtpu: 0.0.40
codegen_flags: <defaults>
</compile_context>

<pallas_src>
import math

import jax
import jax.numpy as jnp
from jax.experimental import pallas as pl
from jax.experimental.pallas import tpu as pltpu

INPUT_SIZE = 128   # fc1_a = Linear(128, 128) is applied to raw x => input_size == 128
OUTPUT_SIZE = 8
BATCH = 8
OUT_COLS = 128     # packed output width: cols 0..39 = heads 0..4, col 40 = sigmoid branch

# (name, in_features, out_features) — weights stored transposed vs. PyTorch.
_LAYERS = [
    ("fc0",   INPUT_SIZE, 128),
    ("fc1_0", 128, 128), ("fc2_0", 128, 32),  ("fc3_0", 32, 16),   ("fc4_0", 16, OUTPUT_SIZE),
    ("fc1_1", 128, 128), ("fc2_1", 128, 32),  ("fc3_1", 32, 16),   ("fc4_1", 16, OUTPUT_SIZE),
    ("fc1_2", 128, 128), ("fc2_2", 128, 64),  ("fc3_2", 64, 32),   ("fc4_2", 32, OUTPUT_SIZE),
    ("fc1_3", 128, 128), ("fc2_3", 128, 128), ("fc3_3", 128, 64),  ("fc4_3", 64, OUTPUT_SIZE),
    ("fc1_4", 128, 128), ("fc2_4", 128, 128), ("fc3_4", 128, 64),  ("fc4_4", 64, OUTPUT_SIZE),
    ("fc1_a", 128, 128), ("fc2_a", 128, 64),  ("fc3_a", 64, 32),   ("fc4_a", 32, 1),
]
_DIMS = {name: (fin, fout) for name, fin, fout in _LAYERS}

# ---- Slab A: weights applied to x (fc0, fc1_a) and to l0 (fc1_0..fc1_4). ----
_A_ORDER = ["fc0", "fc1_a", "fc1_0", "fc1_1", "fc1_2", "fc1_3", "fc1_4"]
_A_COL = {n: 128 * i for i, n in enumerate(_A_ORDER)}
_A_COLS = 128 * len(_A_ORDER)                       # 896

# ---- Slab B: the six fc2 weights, each on a 128-aligned column start. ----
_B_ORDER = ["fc2_0", "fc2_1", "fc2_2", "fc2_3", "fc2_4", "fc2_a"]
_B_COL = {n: 128 * i for i, n in enumerate(_B_ORDER)}
_B_COLS = 128 * len(_B_ORDER)                       # 768

# ---- c2 = concatenated fc2-stage activation (rows of the fc3 block-diag). ----
_C2_OFF, _off = {}, 0
for _n in _B_ORDER:
    _C2_OFF[_n] = _off
    _off += _DIMS[_n][1]
_C2_DIM = _off                                      # 448

# ---- c3 = concatenated fc3-stage activation (rows of the fc4 block-diag). ----
_C3_ORDER = ["fc3_0", "fc3_1", "fc3_2", "fc3_3", "fc3_4", "fc3_a"]
_C3_OFF, _off = {}, 0
for _n in _C3_ORDER:
    _C3_OFF[_n] = _off
    _off += _DIMS[_n][1]
_C3_DIM = _off                                      # 224
_C3_HEADS = _C3_OFF["fc3_a"]                        # 192: relu below, sigmoid at/after

# ---- fc4 block-diag output columns == packed kernel output layout. ----
_FC4_ORDER = ["fc4_0", "fc4_1", "fc4_2", "fc4_3", "fc4_4", "fc4_a"]
_OUT_COL = {f"fc4_{k}": OUTPUT_SIZE * k for k in range(5)}
_OUT_COL["fc4_a"] = 5 * OUTPUT_SIZE                 # 40

# ---- One f32 bias slab: [slab-A cols | slab-B cols | fc3 out | fc4 out]. ----
_B_A = 0
_B_FC2 = _A_COLS                                    # 896
_B_FC3 = _B_FC2 + _B_COLS                           # 1664 (128-aligned)
_B_FC4 = _B_FC3 + 256                               # 1920 (fc3 region padded 224 -> 256)
_BIAS_COLS = _B_FC4 + OUT_COLS                      # 2048


def _kernel(x_ref, b_ref, wA_hbm, wB_hbm, wC_hbm, wD_hbm, out_ref,
            wA_v, wB_v, wC_v, wD_v, c2_v, sem):
    # Start every weight DMA immediately (in order of first use); only wait for
    # each slab right before the stage that needs it, so later slabs stream in
    # under earlier matmuls.
    cpA = pltpu.make_async_copy(wA_hbm, wA_v, sem.at[0]); cpA.start()
    cpB = pltpu.make_async_copy(wB_hbm, wB_v, sem.at[1]); cpB.start()
    cpC = pltpu.make_async_copy(wC_hbm, wC_v, sem.at[2]); cpC.start()
    cpD = pltpu.make_async_copy(wD_hbm, wD_v, sem.at[3]); cpD.start()

    x = x_ref[...].astype(jnp.bfloat16)             # cast once at kernel entry
    relu = lambda t: jnp.maximum(t, 0.0)
    sig = jax.nn.sigmoid

    # ---- Stage A: [fc0 | fc1_a] fused on x, then [fc1_0..fc1_4] fused on l0.
    cpA.wait()
    t0 = (jnp.dot(x, wA_v[:, 0:256], preferred_element_type=jnp.float32)
          + b_ref[0:1, 0:256])
    l0 = relu(t0[:, 0:128]).astype(jnp.bfloat16)
    ha = sig(t0[:, 128:256]).astype(jnp.bfloat16)
    t1 = (jnp.dot(l0, wA_v[:, 256:_A_COLS], preferred_element_type=jnp.float32)
          + b_ref[0:1, 256:_A_COLS])
    u = relu(t1).astype(jnp.bfloat16)               # (B, 640): fc1_k output at cols 128k

    # ---- Stage B: six fc2 matmuls; stage results into the dense c2 buffer.
    # (VMEM-staging stores at 32/64-lane offsets are cheap; the HBM-facing
    #  output below stays a single lane-dense store.)
    cpB.wait()
    for k, name in enumerate(_B_ORDER):
        fout = _DIMS[name][1]
        cw = _B_COL[name]
        co = _C2_OFF[name]
        h_in = u[:, 128 * k:128 * (k + 1)] if k < 5 else ha
        t = (jnp.dot(h_in, wB_v[:, cw:cw + fout],
                     preferred_element_type=jnp.float32)
             + b_ref[0:1, _B_FC2 + cw:_B_FC2 + cw + fout])
        c2_v[:, co:co + fout] = relu(t) if k < 5 else sig(t)
    c2 = c2_v[...].astype(jnp.bfloat16)             # (B, 448)

    # ---- Stage C: fc3 as one block-diagonal matmul; relu heads, sigmoid branch.
    cpC.wait()
    t3 = (jnp.dot(c2, wC_v[...], preferred_element_type=jnp.float32)
          + b_ref[0:1, _B_FC3:_B_FC3 + _C3_DIM])
    lane3 = jax.lax.broadcasted_iota(jnp.int32, t3.shape, 1)
    c3 = jnp.where(lane3 < _C3_HEADS, relu(t3), sig(t3)).astype(jnp.bfloat16)

    # ---- Stage D: fc4 as one block-diagonal matmul whose output layout is the
    # packed result; sigmoid only on the uncertainty column; padding stays 0.
    cpD.wait()
    t4 = (jnp.dot(c3, wD_v[...], preferred_element_type=jnp.float32)
          + b_ref[0:1, _B_FC4:_B_FC4 + OUT_COLS])
    lane4 = jax.lax.broadcasted_iota(jnp.int32, t4.shape, 1)
    out_ref[...] = jnp.where(lane4 == 5 * OUTPUT_SIZE, sig(t4), t4)


def pack_params(params):
    """Pack all weights into four dense bf16 slabs + one f32 bias slab.

    NOTE: weights must be (in_features, out_features), i.e. the TRANSPOSE of
    PyTorch's nn.Linear.weight.  Square layers would not raise a shape error if
    left untransposed, so pass `weight.T` when loading real checkpoints.
    Zero blocks are written as exact f32 zeros and cast to bf16 (exact zeros),
    so block-diag fusion cannot cross-contaminate heads.
    Pack ONCE per parameter set and reuse the slabs across calls.
    """
    wA = jnp.zeros((128, _A_COLS), jnp.float32)
    wB = jnp.zeros((128, _B_COLS), jnp.float32)
    wC = jnp.zeros((_C2_DIM, _C3_DIM), jnp.float32)
    wD = jnp.zeros((_C3_DIM, OUT_COLS), jnp.float32)
    bias = jnp.zeros((1, _BIAS_COLS), jnp.float32)

    def check(name, w):
        fin, fout = _DIMS[name]
        assert w.shape == (fin, fout), (
            f"{name}: expected (in,out)=({fin},{fout}); pass torch weight.T")
        return fin, fout

    for name in _A_ORDER:
        w, b = params[name]
        fin, fout = check(name, w)
        c = _A_COL[name]
        wA = wA.at[0:fin, c:c + fout].set(w)
        bias = bias.at[:, _B_A + c:_B_A + c + fout].set(jnp.reshape(b, (1, fout)))

    for name in _B_ORDER:
        w, b = params[name]
        fin, fout = check(name, w)
        c = _B_COL[name]
        wB = wB.at[0:fin, c:c + fout].set(w)
        bias = bias.at[:, _B_FC2 + c:_B_FC2 + c + fout].set(jnp.reshape(b, (1, fout)))

    for name_fc2, name_fc3 in zip(_B_ORDER, _C3_ORDER):
        w, b = params[name_fc3]
        fin, fout = check(name_fc3, w)
        r = _C2_OFF[name_fc2]
        c = _C3_OFF[name_fc3]
        wC = wC.at[r:r + fin, c:c + fout].set(w)
        bias = bias.at[:, _B_FC3 + c:_B_FC3 + c + fout].set(jnp.reshape(b, (1, fout)))

    for name_fc3, name_fc4 in zip(_C3_ORDER, _FC4_ORDER):
        w, b = params[name_fc4]
        fin, fout = check(name_fc4, w)
        r = _C3_OFF[name_fc3]
        c = _OUT_COL[name_fc4]
        wD = wD.at[r:r + fin, c:c + fout].set(w)
        bias = bias.at[:, _B_FC4 + c:_B_FC4 + c + fout].set(jnp.reshape(b, (1, fout)))

    return (wA.astype(jnp.bfloat16), wB.astype(jnp.bfloat16),
            wC.astype(jnp.bfloat16), wD.astype(jnp.bfloat16), bias)


def policy_ram_ensemble(x, wA, wB, wC, wD, bias):
    batch = x.shape[0]
    vmem = pl.BlockSpec(memory_space=pltpu.MemorySpace.VMEM)
    hbm = pl.BlockSpec(memory_space=pl.ANY)     # raw HBM refs; DMA'd manually in-kernel

    flops = 2 * batch * (128 * 256 + 128 * 640 + 128 * _C2_DIM
                         + _C2_DIM * _C3_DIM + _C3_DIM * OUT_COLS)
    transc = batch * (128 + 64 + _C3_DIM + OUT_COLS)
    wbytes = 2 * (128 * _A_COLS + 128 * _B_COLS
                  + _C2_DIM * _C3_DIM + _C3_DIM * OUT_COLS)
    bytes_accessed = wbytes + 4 * (_BIAS_COLS + batch * INPUT_SIZE + batch * OUT_COLS)

    packed = pl.pallas_call(
        _kernel,
        out_shape=jax.ShapeDtypeStruct((batch, OUT_COLS), jnp.float32),
        in_specs=[vmem, vmem, hbm, hbm, hbm, hbm],
        out_specs=vmem,
        scratch_shapes=[
            pltpu.VMEM((128, _A_COLS), jnp.bfloat16),
            pltpu.VMEM((128, _B_COLS), jnp.bfloat16),
            pltpu.VMEM((_C2_DIM, _C3_DIM), jnp.bfloat16),
            pltpu.VMEM((_C3_DIM, OUT_COLS), jnp.bfloat16),
            pltpu.VMEM((batch, _C2_DIM), jnp.float32),
            pltpu.SemaphoreType.DMA((4,)),
        ],
        cost_estimate=pl.CostEstimate(flops=flops, transcendentals=transc,
                                      bytes_accessed=bytes_accessed),
    )(x, bias, wA, wB, wC, wD)

    heads = tuple(
        packed[:, OUTPUT_SIZE * k:OUTPUT_SIZE * (k + 1)] for k in range(5)
    )
    ha = packed[:, 5 * OUTPUT_SIZE:5 * OUTPUT_SIZE + 1]
    return heads + (ha,)


def init_params(key):
    """Deterministic init mirroring the PyTorch module's __init__ (default
    Linear init = U(-1/sqrt(fan_in), 1/sqrt(fan_in)); the explicitly listed
    layers use normal(mean, 0.01) for weight and/or bias)."""
    special = {  # name -> (w_mean, w_std, b_mean, b_std)
        "fc3_0": (0.0, 0.01, 0.0, 0.01),
        "fc3_1": (0.0, 0.01, 0.25, 0.01),
        "fc3_2": (0.0, 0.01, -0.5, 0.01),
        "fc3_3": (0.0, 0.01, 1.75, 0.01),
        "fc3_4": (0.0, 0.01, 1.0, 0.01),
        "fc4_a": (0.0, 0.01, -4.0, 0.01),
    }
    params = {}
    for i, (name, fin, fout) in enumerate(_LAYERS):
        kw, kb = jax.random.split(jax.random.fold_in(key, i))
        if name in special:
            wm, ws, bm, bs = special[name]
            w = wm + ws * jax.random.normal(kw, (fin, fout), jnp.float32)
            b = bm + bs * jax.random.normal(kb, (fout,), jnp.float32)
        else:
            bound = 1.0 / math.sqrt(fin)
            w = jax.random.uniform(kw, (fin, fout), jnp.float32, -bound, bound)
            b = jax.random.uniform(kb, (fout,), jnp.float32, -bound, bound)
        params[name] = (w, b.reshape(1, fout))
    return params


def _reference(x, params):
    """Pure-JAX reference of the PyTorch forward, with the same bf16 weight /
    activation quantization and f32 accumulation the kernel uses."""
    def lin(name, h):
        w, b = params[name]
        return jnp.dot(h.astype(jnp.bfloat16), w.astype(jnp.bfloat16),
                       preferred_element_type=jnp.float32) + b

    relu = lambda t: jnp.maximum(t, 0.0)
    sig = jax.nn.sigmoid

    l0 = relu(lin("fc0", x))
    heads = []
    for k in range(5):
        h = relu(lin(f"fc1_{k}", l0))
        h = relu(lin(f"fc2_{k}", h))
        h = relu(lin(f"fc3_{k}", h))
        heads.append(lin(f"fc4_{k}", h))
    ha = sig(lin("fc1_a", x))
    ha = sig(lin("fc2_a", ha))
    ha = sig(lin("fc3_a", ha))
    ha = sig(lin("fc4_a", ha))
    return tuple(heads) + (ha,)


if __name__ == "__main__":
    key = jax.random.PRNGKey(0)
    kx, kp = jax.random.split(key)
    x = jax.random.normal(kx, (BATCH, INPUT_SIZE), jnp.float32)
    params = init_params(kp)

    # Pack once; reuse the slabs across calls.
    wA, wB, wC, wD, bias = pack_params(params)

    outs = policy_ram_ensemble(x, wA, wB, wC, wD, bias)
    outs = jax.block_until_ready(outs)

    refs = _reference(x, params)
    for o, r in zip(outs, refs):
        assert o.shape == r.shape and o.dtype == r.dtype
        assert jnp.allclose(o, r, atol=1e-4, rtol=1e-4), "mismatch vs reference"

    print("KERNEL_OK")
</pallas_src>

<mosaic_0001>
module attributes {stable_mosaic.version = 11 : i64} {
  func.func @_kernel(%arg0: memref<8x128xf32, #tpu.memory_space<vmem>>, %arg1: memref<1x2048xf32, #tpu.memory_space<vmem>>, %arg2: memref<128x896xbf16, #tpu.memory_space<any>>, %arg3: memref<128x768xbf16, #tpu.memory_space<any>>, %arg4: memref<448x224xbf16, #tpu.memory_space<any>>, %arg5: memref<224x128xbf16, #tpu.memory_space<any>>, %arg6: memref<8x128xf32, #tpu.memory_space<vmem>>, %arg7: memref<128x896xbf16, #tpu.memory_space<vmem>>, %arg8: memref<128x768xbf16, #tpu.memory_space<vmem>>, %arg9: memref<448x224xbf16, #tpu.memory_space<vmem>>, %arg10: memref<224x128xbf16, #tpu.memory_space<vmem>>, %arg11: memref<8x448xf32, #tpu.memory_space<vmem>>, %arg12: memref<4x!tpu.dma_semaphore, #tpu.memory_space<semaphore_mem>>) attributes {dimension_semantics = [], scalar_prefetch = 0 : i64, scratch_operands = 6 : i64, tpu.core_type = #tpu.core_type<tc>} {
    %c0_i32 = arith.constant 0 : i32
    %0 = tpu.memref_slice %arg12[%c0_i32] : memref<4x!tpu.dma_semaphore, #tpu.memory_space<semaphore_mem>> -> memref<1x!tpu.dma_semaphore, #tpu.memory_space<semaphore_mem>>
    %1 = tpu.memref_squeeze %0 : memref<1x!tpu.dma_semaphore, #tpu.memory_space<semaphore_mem>> -> memref<!tpu.dma_semaphore, #tpu.memory_space<semaphore_mem>>
    tpu.enqueue_dma source(%arg2 : memref<128x896xbf16, #tpu.memory_space<any>>) target(%arg7 : memref<128x896xbf16, #tpu.memory_space<vmem>>) target_semaphore(%1 : memref<!tpu.dma_semaphore, #tpu.memory_space<semaphore_mem>>)
    %c1_i32 = arith.constant 1 : i32
    %2 = tpu.memref_slice %arg12[%c1_i32] : memref<4x!tpu.dma_semaphore, #tpu.memory_space<semaphore_mem>> -> memref<1x!tpu.dma_semaphore, #tpu.memory_space<semaphore_mem>>
    %3 = tpu.memref_squeeze %2 : memref<1x!tpu.dma_semaphore, #tpu.memory_space<semaphore_mem>> -> memref<!tpu.dma_semaphore, #tpu.memory_space<semaphore_mem>>
    tpu.enqueue_dma source(%arg3 : memref<128x768xbf16, #tpu.memory_space<any>>) target(%arg8 : memref<128x768xbf16, #tpu.memory_space<vmem>>) target_semaphore(%3 : memref<!tpu.dma_semaphore, #tpu.memory_space<semaphore_mem>>)
    %c2_i32 = arith.constant 2 : i32
    %4 = tpu.memref_slice %arg12[%c2_i32] : memref<4x!tpu.dma_semaphore, #tpu.memory_space<semaphore_mem>> -> memref<1x!tpu.dma_semaphore, #tpu.memory_space<semaphore_mem>>
    %5 = tpu.memref_squeeze %4 : memref<1x!tpu.dma_semaphore, #tpu.memory_space<semaphore_mem>> -> memref<!tpu.dma_semaphore, #tpu.memory_space<semaphore_mem>>
    tpu.enqueue_dma source(%arg4 : memref<448x224xbf16, #tpu.memory_space<any>>) target(%arg9 : memref<448x224xbf16, #tpu.memory_space<vmem>>) target_semaphore(%5 : memref<!tpu.dma_semaphore, #tpu.memory_space<semaphore_mem>>)
    %c3_i32 = arith.constant 3 : i32
    %6 = tpu.memref_slice %arg12[%c3_i32] : memref<4x!tpu.dma_semaphore, #tpu.memory_space<semaphore_mem>> -> memref<1x!tpu.dma_semaphore, #tpu.memory_space<semaphore_mem>>
    %7 = tpu.memref_squeeze %6 : memref<1x!tpu.dma_semaphore, #tpu.memory_space<semaphore_mem>> -> memref<!tpu.dma_semaphore, #tpu.memory_space<semaphore_mem>>
    tpu.enqueue_dma source(%arg5 : memref<224x128xbf16, #tpu.memory_space<any>>) target(%arg10 : memref<224x128xbf16, #tpu.memory_space<vmem>>) target_semaphore(%7 : memref<!tpu.dma_semaphore, #tpu.memory_space<semaphore_mem>>)
    %c0 = arith.constant 0 : index
    %c0_0 = arith.constant 0 : index
    %8 = vector.load %arg0[%c0, %c0_0] : memref<8x128xf32, #tpu.memory_space<vmem>>, vector<8x128xf32>
    %9 = arith.truncf %8 : vector<8x128xf32> to vector<8x128xbf16>
    %c0_i32_1 = arith.constant 0 : i32
    %10 = tpu.memref_slice %arg12[%c0_i32_1] : memref<4x!tpu.dma_semaphore, #tpu.memory_space<semaphore_mem>> -> memref<1x!tpu.dma_semaphore, #tpu.memory_space<semaphore_mem>>
    %11 = tpu.memref_squeeze %10 : memref<1x!tpu.dma_semaphore, #tpu.memory_space<semaphore_mem>> -> memref<!tpu.dma_semaphore, #tpu.memory_space<semaphore_mem>>
    tpu.wait_dma2 semaphore(%11 : memref<!tpu.dma_semaphore, #tpu.memory_space<semaphore_mem>>) src(%arg2 : memref<128x896xbf16, #tpu.memory_space<any>>) dst(%arg7 : memref<128x896xbf16, #tpu.memory_space<vmem>>)
    %c0_2 = arith.constant 0 : index
    %c0_3 = arith.constant 0 : index
    %12 = vector.load %arg7[%c0_2, %c0_3] : memref<128x896xbf16, #tpu.memory_space<vmem>>, vector<128x256xbf16>
    %cst = arith.constant dense<0.000000e+00> : vector<8x256xf32>
    %13 = tpu.matmul %9, %12, %cst {dimension_numbers = #tpu.dot_dimension_numbers<[1], [0], [0], [1], [0, 0, 1, 1], [], []>} : vector<8x128xbf16>, vector<128x256xbf16>, vector<8x256xf32> -> vector<8x256xf32>
    %c0_4 = arith.constant 0 : index
    %c0_5 = arith.constant 0 : index
    %14 = vector.load %arg1[%c0_4, %c0_5] : memref<1x2048xf32, #tpu.memory_space<vmem>>, vector<1x256xf32>
    %15 = vector.broadcast %14 : vector<1x256xf32> to vector<8x256xf32>
    %16 = arith.addf %13, %15 : vector<8x256xf32>
    %17 = vector.extract_strided_slice %16 {offsets = [0, 0], sizes = [8, 128], strides = [1, 1]} : vector<8x256xf32> to vector<8x128xf32>
    %cst_6 = arith.constant 0.000000e+00 : f32
    %18 = vector.broadcast %cst_6 : f32 to vector<8x128xf32>
    %19 = arith.maximumf %17, %18 : vector<8x128xf32>
    %20 = arith.truncf %19 : vector<8x128xf32> to vector<8x128xbf16>
    %21 = vector.extract_strided_slice %16 {offsets = [0, 128], sizes = [8, 128], strides = [1, 1]} : vector<8x256xf32> to vector<8x128xf32>
    %22 = arith.negf %21 : vector<8x128xf32>
    %23 = math.exp %22 : vector<8x128xf32>
    %cst_7 = arith.constant 1.000000e+00 : f32
    %24 = vector.broadcast %cst_7 : f32 to vector<8x128xf32>
    %25 = arith.addf %24, %23 : vector<8x128xf32>
    %26 = arith.divf %24, %25 : vector<8x128xf32>
    %27 = arith.truncf %26 : vector<8x128xf32> to vector<8x128xbf16>
    %c0_8 = arith.constant 0 : index
    %c256 = arith.constant 256 : index
    %28 = vector.load %arg7[%c0_8, %c256] : memref<128x896xbf16, #tpu.memory_space<vmem>>, vector<128x640xbf16>
    %cst_9 = arith.constant dense<0.000000e+00> : vector<8x640xf32>
    %29 = tpu.matmul %20, %28, %cst_9 {dimension_numbers = #tpu.dot_dimension_numbers<[1], [0], [0], [1], [0, 0, 1, 1], [], []>} : vector<8x128xbf16>, vector<128x640xbf16>, vector<8x640xf32> -> vector<8x640xf32>
    %c0_10 = arith.constant 0 : index
    %c256_11 = arith.constant 256 : index
    %30 = vector.load %arg1[%c0_10, %c256_11] : memref<1x2048xf32, #tpu.memory_space<vmem>>, vector<1x640xf32>
    %31 = vector.broadcast %30 : vector<1x640xf32> to vector<8x640xf32>
    %32 = arith.addf %29, %31 : vector<8x640xf32>
    %cst_12 = arith.constant 0.000000e+00 : f32
    %33 = vector.broadcast %cst_12 : f32 to vector<8x640xf32>
    %34 = arith.maximumf %32, %33 : vector<8x640xf32>
    %35 = arith.truncf %34 : vector<8x640xf32> to vector<8x640xbf16>
    %c1_i32_13 = arith.constant 1 : i32
    %36 = tpu.memref_slice %arg12[%c1_i32_13] : memref<4x!tpu.dma_semaphore, #tpu.memory_space<semaphore_mem>> -> memref<1x!tpu.dma_semaphore, #tpu.memory_space<semaphore_mem>>
    %37 = tpu.memref_squeeze %36 : memref<1x!tpu.dma_semaphore, #tpu.memory_space<semaphore_mem>> -> memref<!tpu.dma_semaphore, #tpu.memory_space<semaphore_mem>>
    tpu.wait_dma2 semaphore(%37 : memref<!tpu.dma_semaphore, #tpu.memory_space<semaphore_mem>>) src(%arg3 : memref<128x768xbf16, #tpu.memory_space<any>>) dst(%arg8 : memref<128x768xbf16, #tpu.memory_space<vmem>>)
    %38 = vector.extract_strided_slice %35 {offsets = [0, 0], sizes = [8, 128], strides = [1, 1]} : vector<8x640xbf16> to vector<8x128xbf16>
    %c0_14 = arith.constant 0 : index
    %c0_15 = arith.constant 0 : index
    %39 = vector.load %arg8[%c0_14, %c0_15] : memref<128x768xbf16, #tpu.memory_space<vmem>>, vector<128x32xbf16>
    %cst_16 = arith.constant dense<0.000000e+00> : vector<8x32xf32>
    %40 = tpu.matmul %38, %39, %cst_16 {dimension_numbers = #tpu.dot_dimension_numbers<[1], [0], [0], [1], [0, 0, 1, 1], [], []>} : vector<8x128xbf16>, vector<128x32xbf16>, vector<8x32xf32> -> vector<8x32xf32>
    %c0_17 = arith.constant 0 : index
    %c896 = arith.constant 896 : index
    %41 = vector.load %arg1[%c0_17, %c896] : memref<1x2048xf32, #tpu.memory_space<vmem>>, vector<1x32xf32>
    %42 = vector.broadcast %41 : vector<1x32xf32> to vector<8x32xf32>
    %43 = arith.addf %40, %42 : vector<8x32xf32>
    %cst_18 = arith.constant 0.000000e+00 : f32
    %44 = vector.broadcast %cst_18 : f32 to vector<8x32xf32>
    %45 = arith.maximumf %43, %44 : vector<8x32xf32>
    %c0_19 = arith.constant 0 : index
    %c0_20 = arith.constant 0 : index
    %46 = vector.load %arg11[%c0_19, %c0_20] : memref<8x448xf32, #tpu.memory_space<vmem>>, vector<8x32xf32>
    tpu.vector_store %arg11[%c0_19, %c0_20], %45 {strides = array<i32>} : memref<8x448xf32, #tpu.memory_space<vmem>>, vector<8x32xf32>,
    %47 = vector.extract_strided_slice %35 {offsets = [0, 128], sizes = [8, 128], strides = [1, 1]} : vector<8x640xbf16> to vector<8x128xbf16>
    %c0_21 = arith.constant 0 : index
    %c128 = arith.constant 128 : index
    %48 = vector.load %arg8[%c0_21, %c128] : memref<128x768xbf16, #tpu.memory_space<vmem>>, vector<128x32xbf16>
    %cst_22 = arith.constant dense<0.000000e+00> : vector<8x32xf32>
    %49 = tpu.matmul %47, %48, %cst_22 {dimension_numbers = #tpu.dot_dimension_numbers<[1], [0], [0], [1], [0, 0, 1, 1], [], []>} : vector<8x128xbf16>, vector<128x32xbf16>, vector<8x32xf32> -> vector<8x32xf32>
    %c0_23 = arith.constant 0 : index
    %c1024 = arith.constant 1024 : index
    %50 = vector.load %arg1[%c0_23, %c1024] : memref<1x2048xf32, #tpu.memory_space<vmem>>, vector<1x32xf32>
    %51 = vector.broadcast %50 : vector<1x32xf32> to vector<8x32xf32>
    %52 = arith.addf %49, %51 : vector<8x32xf32>
    %cst_24 = arith.constant 0.000000e+00 : f32
    %53 = vector.broadcast %cst_24 : f32 to vector<8x32xf32>
    %54 = arith.maximumf %52, %53 : vector<8x32xf32>
    %c0_25 = arith.constant 0 : index
    %c32 = arith.constant 32 : index
    %55 = vector.load %arg11[%c0_25, %c32] : memref<8x448xf32, #tpu.memory_space<vmem>>, vector<8x32xf32>
    tpu.vector_store %arg11[%c0_25, %c32], %54 {strides = array<i32>} : memref<8x448xf32, #tpu.memory_space<vmem>>, vector<8x32xf32>,
    %56 = vector.extract_strided_slice %35 {offsets = [0, 256], sizes = [8, 128], strides = [1, 1]} : vector<8x640xbf16> to vector<8x128xbf16>
    %c0_26 = arith.constant 0 : index
    %c256_27 = arith.constant 256 : index
    %57 = vector.load %arg8[%c0_26, %c256_27] : memref<128x768xbf16, #tpu.memory_space<vmem>>, vector<128x64xbf16>
    %cst_28 = arith.constant dense<0.000000e+00> : vector<8x64xf32>
    %58 = tpu.matmul %56, %57, %cst_28 {dimension_numbers = #tpu.dot_dimension_numbers<[1], [0], [0], [1], [0, 0, 1, 1], [], []>} : vector<8x128xbf16>, vector<128x64xbf16>, vector<8x64xf32> -> vector<8x64xf32>
    %c0_29 = arith.constant 0 : index
    %c1152 = arith.constant 1152 : index
    %59 = vector.load %arg1[%c0_29, %c1152] : memref<1x2048xf32, #tpu.memory_space<vmem>>, vector<1x64xf32>
    %60 = vector.broadcast %59 : vector<1x64xf32> to vector<8x64xf32>
    %61 = arith.addf %58, %60 : vector<8x64xf32>
    %cst_30 = arith.constant 0.000000e+00 : f32
    %62 = vector.broadcast %cst_30 : f32 to vector<8x64xf32>
    %63 = arith.maximumf %61, %62 : vector<8x64xf32>
    %c0_31 = arith.constant 0 : index
    %c64 = arith.constant 64 : index
    %64 = vector.load %arg11[%c0_31, %c64] : memref<8x448xf32, #tpu.memory_space<vmem>>, vector<8x64xf32>
    tpu.vector_store %arg11[%c0_31, %c64], %63 {strides = array<i32>} : memref<8x448xf32, #tpu.memory_space<vmem>>, vector<8x64xf32>,
    %65 = vector.extract_strided_slice %35 {offsets = [0, 384], sizes = [8, 128], strides = [1, 1]} : vector<8x640xbf16> to vector<8x128xbf16>
    %c0_32 = arith.constant 0 : index
    %c384 = arith.constant 384 : index
    %66 = vector.load %arg8[%c0_32, %c384] : memref<128x768xbf16, #tpu.memory_space<vmem>>, vector<128x128xbf16>
    %cst_33 = arith.constant dense<0.000000e+00> : vector<8x128xf32>
    %67 = tpu.matmul %65, %66, %cst_33 {dimension_numbers = #tpu.dot_dimension_numbers<[1], [0], [0], [1], [0, 0, 1, 1], [], []>} : vector<8x128xbf16>, vector<128x128xbf16>, vector<8x128xf32> -> vector<8x128xf32>
    %c0_34 = arith.constant 0 : index
    %c1280 = arith.constant 1280 : index
    %68 = vector.load %arg1[%c0_34, %c1280] : memref<1x2048xf32, #tpu.memory_space<vmem>>, vector<1x128xf32>
    %69 = vector.broadcast %68 : vector<1x128xf32> to vector<8x128xf32>
    %70 = arith.addf %67, %69 : vector<8x128xf32>
    %cst_35 = arith.constant 0.000000e+00 : f32
    %71 = vector.broadcast %cst_35 : f32 to vector<8x128xf32>
    %72 = arith.maximumf %70, %71 : vector<8x128xf32>
    %c0_36 = arith.constant 0 : index
    %c128_37 = arith.constant 128 : index
    %73 = vector.load %arg11[%c0_36, %c128_37] : memref<8x448xf32, #tpu.memory_space<vmem>>, vector<8x128xf32>
    tpu.vector_store %arg11[%c0_36, %c128_37], %72 {strides = array<i32>} : memref<8x448xf32, #tpu.memory_space<vmem>>, vector<8x128xf32>,
    %74 = vector.extract_strided_slice %35 {offsets = [0, 512], sizes = [8, 128], strides = [1, 1]} : vector<8x640xbf16> to vector<8x128xbf16>
    %c0_38 = arith.constant 0 : index
    %c512 = arith.constant 512 : index
    %75 = vector.load %arg8[%c0_38, %c512] : memref<128x768xbf16, #tpu.memory_space<vmem>>, vector<128x128xbf16>
    %cst_39 = arith.constant dense<0.000000e+00> : vector<8x128xf32>
    %76 = tpu.matmul %74, %75, %cst_39 {dimension_numbers = #tpu.dot_dimension_numbers<[1], [0], [0], [1], [0, 0, 1, 1], [], []>} : vector<8x128xbf16>, vector<128x128xbf16>, vector<8x128xf32> -> vector<8x128xf32>
    %c0_40 = arith.constant 0 : index
    %c1408 = arith.constant 1408 : index
    %77 = vector.load %arg1[%c0_40, %c1408] : memref<1x2048xf32, #tpu.memory_space<vmem>>, vector<1x128xf32>
    %78 = vector.broadcast %77 : vector<1x128xf32> to vector<8x128xf32>
    %79 = arith.addf %76, %78 : vector<8x128xf32>
    %cst_41 = arith.constant 0.000000e+00 : f32
    %80 = vector.broadcast %cst_41 : f32 to vector<8x128xf32>
    %81 = arith.maximumf %79, %80 : vector<8x128xf32>
    %c0_42 = arith.constant 0 : index
    %c256_43 = arith.constant 256 : index
    %82 = vector.load %arg11[%c0_42, %c256_43] : memref<8x448xf32, #tpu.memory_space<vmem>>, vector<8x128xf32>
    tpu.vector_store %arg11[%c0_42, %c256_43], %81 {strides = array<i32>} : memref<8x448xf32, #tpu.memory_space<vmem>>, vector<8x128xf32>,
    %c0_44 = arith.constant 0 : index
    %c640 = arith.constant 640 : index
    %83 = vector.load %arg8[%c0_44, %c640] : memref<128x768xbf16, #tpu.memory_space<vmem>>, vector<128x64xbf16>
    %cst_45 = arith.constant dense<0.000000e+00> : vector<8x64xf32>
    %84 = tpu.matmul %27, %83, %cst_45 {dimension_numbers = #tpu.dot_dimension_numbers<[1], [0], [0], [1], [0, 0, 1, 1], [], []>} : vector<8x128xbf16>, vector<128x64xbf16>, vector<8x64xf32> -> vector<8x64xf32>
    %c0_46 = arith.constant 0 : index
    %c1536 = arith.constant 1536 : index
    %85 = vector.load %arg1[%c0_46, %c1536] : memref<1x2048xf32, #tpu.memory_space<vmem>>, vector<1x64xf32>
    %86 = vector.broadcast %85 : vector<1x64xf32> to vector<8x64xf32>
    %87 = arith.addf %84, %86 : vector<8x64xf32>
    %88 = arith.negf %87 : vector<8x64xf32>
    %89 = math.exp %88 : vector<8x64xf32>
    %cst_47 = arith.constant 1.000000e+00 : f32
    %90 = vector.broadcast %cst_47 : f32 to vector<8x64xf32>
    %91 = arith.addf %90, %89 : vector<8x64xf32>
    %92 = arith.divf %90, %91 : vector<8x64xf32>
    %c0_48 = arith.constant 0 : index
    %c384_49 = arith.constant 384 : index
    %93 = vector.load %arg11[%c0_48, %c384_49] : memref<8x448xf32, #tpu.memory_space<vmem>>, vector<8x64xf32>
    tpu.vector_store %arg11[%c0_48, %c384_49], %92 {strides = array<i32>} : memref<8x448xf32, #tpu.memory_space<vmem>>, vector<8x64xf32>,
    %c0_50 = arith.constant 0 : index
    %c0_51 = arith.constant 0 : index
    %94 = vector.load %arg11[%c0_50, %c0_51] : memref<8x448xf32, #tpu.memory_space<vmem>>, vector<8x448xf32>
    %95 = arith.truncf %94 : vector<8x448xf32> to vector<8x448xbf16>
    %c2_i32_52 = arith.constant 2 : i32
    %96 = tpu.memref_slice %arg12[%c2_i32_52] : memref<4x!tpu.dma_semaphore, #tpu.memory_space<semaphore_mem>> -> memref<1x!tpu.dma_semaphore, #tpu.memory_space<semaphore_mem>>
    %97 = tpu.memref_squeeze %96 : memref<1x!tpu.dma_semaphore, #tpu.memory_space<semaphore_mem>> -> memref<!tpu.dma_semaphore, #tpu.memory_space<semaphore_mem>>
    tpu.wait_dma2 semaphore(%97 : memref<!tpu.dma_semaphore, #tpu.memory_space<semaphore_mem>>) src(%arg4 : memref<448x224xbf16, #tpu.memory_space<any>>) dst(%arg9 : memref<448x224xbf16, #tpu.memory_space<vmem>>)
    %c0_53 = arith.constant 0 : index
    %c0_54 = arith.constant 0 : index
    %98 = vector.load %arg9[%c0_53, %c0_54] : memref<448x224xbf16, #tpu.memory_space<vmem>>, vector<448x224xbf16>
    %cst_55 = arith.constant dense<0.000000e+00> : vector<8x224xf32>
    %99 = tpu.matmul %95, %98, %cst_55 {dimension_numbers = #tpu.dot_dimension_numbers<[1], [0], [0], [1], [0, 0, 1, 1], [], []>} : vector<8x448xbf16>, vector<448x224xbf16>, vector<8x224xf32> -> vector<8x224xf32>
    %c0_56 = arith.constant 0 : index
    %c1664 = arith.constant 1664 : index
    %100 = vector.load %arg1[%c0_56, %c1664] : memref<1x2048xf32, #tpu.memory_space<vmem>>, vector<1x224xf32>
    %101 = vector.broadcast %100 : vector<1x224xf32> to vector<8x224xf32>
    %102 = arith.addf %99, %101 : vector<8x224xf32>
    %103 = tpu.iota {dimensions = array<i32: 1>} : vector<8x224xi32>
    %c192_i32 = arith.constant 192 : i32
    %104 = vector.broadcast %c192_i32 : i32 to vector<8x224xi32>
    %105 = arith.cmpi slt, %103, %104 : vector<8x224xi32>
    %cst_57 = arith.constant 0.000000e+00 : f32
    %106 = vector.broadcast %cst_57 : f32 to vector<8x224xf32>
    %107 = arith.maximumf %102, %106 : vector<8x224xf32>
    %108 = arith.negf %102 : vector<8x224xf32>
    %109 = math.exp %108 : vector<8x224xf32>
    %cst_58 = arith.constant 1.000000e+00 : f32
    %110 = vector.broadcast %cst_58 : f32 to vector<8x224xf32>
    %111 = arith.addf %110, %109 : vector<8x224xf32>
    %112 = arith.divf %110, %111 : vector<8x224xf32>
    %113 = arith.select %105, %107, %112 : vector<8x224xi1>, vector<8x224xf32>
    %114 = arith.truncf %113 : vector<8x224xf32> to vector<8x224xbf16>
    %c3_i32_59 = arith.constant 3 : i32
    %115 = tpu.memref_slice %arg12[%c3_i32_59] : memref<4x!tpu.dma_semaphore, #tpu.memory_space<semaphore_mem>> -> memref<1x!tpu.dma_semaphore, #tpu.memory_space<semaphore_mem>>
    %116 = tpu.memref_squeeze %115 : memref<1x!tpu.dma_semaphore, #tpu.memory_space<semaphore_mem>> -> memref<!tpu.dma_semaphore, #tpu.memory_space<semaphore_mem>>
    tpu.wait_dma2 semaphore(%116 : memref<!tpu.dma_semaphore, #tpu.memory_space<semaphore_mem>>) src(%arg5 : memref<224x128xbf16, #tpu.memory_space<any>>) dst(%arg10 : memref<224x128xbf16, #tpu.memory_space<vmem>>)
    %c0_60 = arith.constant 0 : index
    %c0_61 = arith.constant 0 : index
    %117 = vector.load %arg10[%c0_60, %c0_61] : memref<224x128xbf16, #tpu.memory_space<vmem>>, vector<224x128xbf16>
    %cst_62 = arith.constant dense<0.000000e+00> : vector<8x128xf32>
    %118 = tpu.matmul %114, %117, %cst_62 {dimension_numbers = #tpu.dot_dimension_numbers<[1], [0], [0], [1], [0, 0, 1, 1], [], []>} : vector<8x224xbf16>, vector<224x128xbf16>, vector<8x128xf32> -> vector<8x128xf32>
    %c0_63 = arith.constant 0 : index
    %c1920 = arith.constant 1920 : index
    %119 = vector.load %arg1[%c0_63, %c1920] : memref<1x2048xf32, #tpu.memory_space<vmem>>, vector<1x128xf32>
    %120 = vector.broadcast %119 : vector<1x128xf32> to vector<8x128xf32>
    %121 = arith.addf %118, %120 : vector<8x128xf32>
    %122 = tpu.iota {dimensions = array<i32: 1>} : vector<8x128xi32>
    %c40_i32 = arith.constant 40 : i32
    %123 = vector.broadcast %c40_i32 : i32 to vector<8x128xi32>
    %124 = arith.cmpi eq, %122, %123 : vector<8x128xi32>
    %125 = arith.negf %121 : vector<8x128xf32>
    %126 = math.exp %125 : vector<8x128xf32>
    %cst_64 = arith.constant 1.000000e+00 : f32
    %127 = vector.broadcast %cst_64 : f32 to vector<8x128xf32>
    %128 = arith.addf %127, %126 : vector<8x128xf32>
    %129 = arith.divf %127, %128 : vector<8x128xf32>
    %130 = arith.select %124, %129, %121 : vector<8x128xi1>, vector<8x128xf32>
    %c0_65 = arith.constant 0 : index
    %c0_66 = arith.constant 0 : index
    %131 = vector.load %arg6[%c0_65, %c0_66] : memref<8x128xf32, #tpu.memory_space<vmem>>, vector<8x128xf32>
    tpu.vector_store %arg6[%c0_65, %c0_66], %130 {strides = array<i32>} : memref<8x128xf32, #tpu.memory_space<vmem>>, vector<8x128xf32>,
    return
  }
}

</mosaic_0001>

<bundles_post_ra>
// kernel: tpu_custom_call.1
= control target key start
LH: loop header
LB: loop body
LE: loop exit
PB: predicated region body
PF: predicated region fallthrough
CT: control target
= control target key end

     0   :  { %11 = vsyncpa [#allocation9], 0  ;;  %s3072_s0 = inlined_call_operand.hbm [shape: f32[8,128], index: 0, kind: input, shape index: {}]   ;;  %s3073_s1 = inlined_call_operand.hbm [shape: f32[1,2048], index: 1, kind: input, shape index: {}]   ;;  %s3074_s2 = inlined_call_operand.hbm [shape: bf16[128,896], index: 2, kind: input, shape index: {}]   ;;  %s3075_s3 = inlined_call_operand.hbm [shape: bf16[128,768], index: 3, kind: input, shape index: {}]   ;;  %s3076_s4 = inlined_call_operand.hbm [shape: bf16[448,224], index: 4, kind: input, shape index: {}]   ;;  %s3077_s5 = inlined_call_operand.hbm [shape: bf16[224,128], index: 5, kind: input, shape index: {}]   ;;  %s3078_s6 = inlined_call_operand.hbm [shape: f32[8,128], index: 6, kind: output, shape index: {}]  }
   0x1   :  { %12 = vsyncpa [#allocation12], 0 }
   0x2   :  { %13 = vsyncpa [#allocation10], 0  ;;  %s19_s23 = sshll.u32 %s3072_s0, 4  ;;  %s2959_s24 = smov [#allocation8]   ;;  %s20_s23 = int_to_ptr.hbm [resolvable:$true] %s19_s23 }
   0x3   :  { %s21_s25 = sshll.u32 %s2959_s24, 4  ;;  %s30_s28 = sshll.u32 %s3073_s1, 4  ;;  %s22_s25 = int_to_ptr.vmem [resolvable:$true] %s21_s25  ;;  %s31_s28 = int_to_ptr.hbm [resolvable:$true] %s30_s28 }
   0x4   :  { %24 = dma.hbm_to_vmem [thread:$0]  %s20_s23, 128, %s22_s25, [#allocation9]  }
   0x5   :  { %s2960_s29 = smov [#allocation11]  }
   0x6   :  { %s32_s30 = sshll.u32 %s2960_s29, 4  ;;  %s33_s30 = int_to_ptr.vmem [resolvable:$true] %s32_s30 }
   0x7   :  { %35 = dma.hbm_to_vmem [thread:$0]  %s31_s28, 256, %s33_s30, [#allocation12]  }
   0x8   :  { %2945 = dma.done.wait [#allocation9], 128  }
   0x9   :  { %2946 = vsyncadd [#allocation9], 4294967168 }
   0xa   :  { %2947 = dma.done.wait [#allocation12], 256  }
   0xb   :  { %2948 = vsyncadd [#allocation12], 4294967040  ;;  %s52_s8 = sshll.u32 %s3074_s2, 4  ;;  %s2961_s9 = smov [#allocation2]   ;;  %v100_v0 = vld [vmem:[#allocation8] sm:$0xff]  ;;  %s53_s8 = int_to_ptr.hbm [resolvable:$true] %s52_s8 }
   0xc   :  { %s54_s10 = sshll.u32 %s2961_s9, 4  ;;  %s66_s12 = sshll.u32 %s3075_s3, 4  ;;  %v3018_v1 = vpack.c.bf16 %v100_v0, %v100_v0  ;;  %s55_s10 = int_to_ptr.vmem [resolvable:$true] %s54_s10  ;;  %s67_s12 = int_to_ptr.hbm [resolvable:$true] %s66_s12 }
   0xd   :  { %57 = dma.hbm_to_vmem [thread:$0]  %s53_s8, 7168, %s55_s10, [#allocation7] }
   0xe   :  { %s2962_s13 = smov [#allocation3]   ;;  %s80_s17 = sshll.u32 %s3076_s4, 4  ;;  %s81_s17 = int_to_ptr.hbm [resolvable:$true] %s80_s17 }
   0xf   :  { %s68_s14 = sshll.u32 %s2962_s13, 4  ;;  %s94_s19 = sshll.u32 %s3077_s5, 4  ;;  %s69_s14 = int_to_ptr.vmem [resolvable:$true] %s68_s14  ;;  %s95_s19 = int_to_ptr.hbm [resolvable:$true] %s94_s19 }
  0x10   :  { %71 = dma.hbm_to_vmem [thread:$0]  %s67_s12, 6144, %s69_s14, [#allocation7 + $0x1] }
  0x11   :  { %s2963_s20 = smov [#allocation4]   ;;  %s2964_s21 = smov [#allocation5]  }
  0x12   :  { %s82_s3 = sshll.u32 %s2963_s20, 4  ;;  %s96_s22 = sshll.u32 %s2964_s21, 4  ;;  %s83_s3 = int_to_ptr.vmem [resolvable:$true] %s82_s3  ;;  %s97_s22 = int_to_ptr.vmem [resolvable:$true] %s96_s22 }
  0x13   :  { %85 = dma.hbm_to_vmem [thread:$0]  %s81_s17, 7168, %s83_s3, [#allocation7 + $0x2] }
  0x14   :  { %99 = dma.hbm_to_vmem [thread:$0]  %s95_s19, 1792, %s97_s22, [#allocation7 + $0x3] }
  0x15   :  { %2949 = dma.done.wait [#allocation7], 7168 }
  0x16   :  { %2950 = vsyncadd [#allocation7], 4294960128  ;;  %v1921_v2 = vld [vmem:[#allocation2 + $0x188] sm:$0xf]  ;;  %v2586_v3 = vld [vmem:[#allocation2 + $0x1a0] sm:$0xf0] }
  0x17   :  { %v1913_v4 = vld [vmem:[#allocation2 + $0x150] sm:$0xf]  ;;  %v1922_v5 = vor.u32 %v2586_v3, %v1921_v2  ;;  %v2584_v6 = vld [vmem:[#allocation2 + $0x168] sm:$0xf0]  ;;  %v1905_v8 = vld [vmem:[#allocation2 + $0x118] sm:$0xf] }
  0x18   :  { %v1914_v7 = vor.u32 %v2584_v6, %v1913_v4  ;;  %v2582_v9 = vld [vmem:[#allocation2 + $0x130] sm:$0xf0]  ;;  %v2585_v10 = vld [vmem:[#allocation2 + $0x18c] sm:$0xf]  ;;  %v1923_v11 = vld [vmem:[#allocation2 + $0x1a4] sm:$0xf0] }
  0x19   :  { %208 = vmatpush.bf16.msra.mxu0 %v1922_v5  ;;  %v1926_v12 = vor.u32 %v2585_v10, %v1923_v11  ;;  %v2583_v13 = vld [vmem:[#allocation2 + $0x154] sm:$0xf]  ;;  %v1915_v14 = vld [vmem:[#allocation2 + $0x16c] sm:$0xf0]  ;;  %v1906_v15 = vor.u32 %v2582_v9, %v1905_v8  ;;  %v1897_v16 = vld [vmem:[#allocation2 + $0xe0] sm:$0xf] }
  0x1a   :  { %v2580_v17 = vld [vmem:[#allocation2 + $0xf8] sm:$0xf0]  ;;  %v1918_v18 = vor.u32 %v2583_v13, %v1915_v14  ;;  %v2070_v19 = vld [vmem:[#allocation2 + $0x190] sm:$0xf]  ;;  %v1907_v21 = vld [vmem:[#allocation2 + $0x134] sm:$0xf0] }
  0x1b   :  { %221 = vmatpush.bf16.msra.mxu1 %v1926_v12  ;;  %v2581_v20 = vld [vmem:[#allocation2 + $0x11c] sm:$0xf]  ;;  %v2624_v22 = vld [vmem:[#allocation2 + $0x1a8] sm:$0xf0]  ;;  %v2050_v24 = vld [vmem:[#allocation2 + $0x158] sm:$0xf]  ;;  %v1898_v26 = vor.u32 %v2580_v17, %v1897_v16 }
  0x1c   :  { %v2071_v23 = vor.u32 %v2624_v22, %v2070_v19  ;;  %v2619_v25 = vld [vmem:[#allocation2 + $0x170] sm:$0xf0]  ;;  %v1889_v27 = vld [vmem:[#allocation2 + $0xa8] sm:$0xf]  ;;  %v2578_v28 = vld [vmem:[#allocation2 + $0xc0] sm:$0xf0]  ;;  %v1910_v29 = vor.u32 %v2581_v20, %v1907_v21 }
  0x1d   :  { %209 = vmatpush.bf16.msra.mxu0 %v1914_v7  ;;  %v2579_v30 = vld [vmem:[#allocation2 + $0xe4] sm:$0xf]  ;;  %v1899_v31 = vld [vmem:[#allocation2 + $0xfc] sm:$0xf0]  ;;  %v2051_v32 = vor.u32 %v2619_v25, %v2050_v24  ;;  %v2614_v34 = vld [vmem:[#allocation2 + $0x138] sm:$0xf0]  ;;  %v1890_v38 = vor.u32 %v2578_v28, %v1889_v27 }
  0x1e   :  { %524 = vmatpush.bf16.msra.mxu2 %v2071_v23  ;;  %v2030_v33 = vld [vmem:[#allocation2 + $0x120] sm:$0xf]  ;;  %v2622_v35 = vld [vmem:[#allocation2 + $0x194] sm:$0xf]  ;;  %v2072_v36 = vld [vmem:[#allocation2 + $0x1ac] sm:$0xf0]  ;;  %v1902_v41 = vor.u32 %v2579_v30, %v1899_v31 }
  0x1f   :  { %222 = vmatpush.bf16.msra.mxu1 %v1918_v18  ;;  %v2075_v37 = vor.u32 %v2622_v35, %v2072_v36  ;;  %v1881_v39 = vld [vmem:[#allocation2 + $0x70] sm:$0xf]  ;;  %v2576_v40 = vld [vmem:[#allocation2 + $0x88] sm:$0xf0]  ;;  %v2031_v43 = vor.u32 %v2614_v34, %v2030_v33  ;;  %v2617_v44 = vld [vmem:[#allocation2 + $0x15c] sm:$0xf] }
  0x20   :  { %v2577_v42 = vld [vmem:[#allocation2 + $0xac] sm:$0xf]  ;;  %v2052_v45 = vld [vmem:[#allocation2 + $0x174] sm:$0xf0]  ;;  %v1891_v46 = vld [vmem:[#allocation2 + $0xc4] sm:$0xf0]  ;;  %v1882_v51 = vor.u32 %v2576_v40, %v1881_v39 }
  0x21   :  { %210 = vmatpush.bf16.msra.mxu0 %v1906_v15  ;;  %v2010_v47 = vld [vmem:[#allocation2 + $0xe8] sm:$0xf]  ;;  %v2609_v48 = vld [vmem:[#allocation2 + $0x100] sm:$0xf0]  ;;  %537 = vmatpush.bf16.msra.mxu3 %v2075_v37  ;;  %v2055_v49 = vor.u32 %v2617_v44, %v2052_v45  ;;  %v2032_v52 = vld [vmem:[#allocation2 + $0x13c] sm:$0xf0]  ;;  %v1894_v55 = vor.u32 %v2577_v42, %v1891_v46 }
  0x22   :  { %525 = vmatpush.bf16.msra.mxu2 %v2051_v32  ;;  %v2612_v50 = vld [vmem:[#allocation2 + $0x124] sm:$0xf]  ;;  %v1873_v53 = vld [vmem:[#allocation2 + $0x38] sm:$0xf]  ;;  %v2574_v54 = vld [vmem:[#allocation2 + $0x50] sm:$0xf0]  ;;  %v2011_v57 = vor.u32 %v2609_v48, %v2010_v47 }
  0x23   :  { %223 = vmatpush.bf16.msra.mxu1 %v1910_v29  ;;  %v2575_v56 = vld [vmem:[#allocation2 + $0x74] sm:$0xf]  ;;  %v1883_v58 = vld [vmem:[#allocation2 + $0x8c] sm:$0xf0]  ;;  %v2604_v60 = vld [vmem:[#allocation2 + $0xc8] sm:$0xf0]  ;;  %v2035_v61 = vor.u32 %v2612_v50, %v2032_v52  ;;  %v1874_v0 = vor.u32 %v2574_v54, %v1873_v53 }
  0x24   :  { %v1990_v59 = vld [vmem:[#allocation2 + $0xb0] sm:$0xf]  ;;  %v2607_v62 = vld [vmem:[#allocation2 + $0xec] sm:$0xf]  ;;  %v2012_v63 = vld [vmem:[#allocation2 + $0x104] sm:$0xf0]  ;;  %v1886_v4 = vor.u32 %v2575_v56, %v1883_v58 }
  0x25   :  { %211 = vmatpush.bf16.msra.mxu0 %v1898_v26  ;;  %538 = vmatpush.bf16.msra.mxu3 %v2055_v49  ;;  %v1865_v2 = vld [vmem:[#allocation2] sm:$0xf]  ;;  %v2572_v3 = vld [vmem:[#allocation2 + $0x18] sm:$0xf0]  ;;  %v1875_v6 = vld [vmem:[#allocation2 + $0x54] sm:$0xf0]  ;;  %v1991_v7 = vor.u32 %v2604_v60, %v1990_v59  ;;  %v2015_v11 = vor.u32 %v2607_v62, %v2012_v63 }
  0x26   :  { %526 = vmatpush.bf16.msra.mxu2 %v2031_v43  ;;  %v2573_v5 = vld [vmem:[#allocation2 + $0x3c] sm:$0xf]  ;;  %v2078_v8 = vld [vmem:[#allocation2 + $0x198] sm:$0xf]  ;;  %v2625_v9 = vld [vmem:[#allocation2 + $0x1b0] sm:$0xf0]  ;;  %v1866_v15 = vor.u32 %v2572_v3, %v1865_v2 }
  0x27   :  { %224 = vmatpush.bf16.msra.mxu1 %v1902_v41  ;;  %v1970_v10 = vld [vmem:[#allocation2 + $0x78] sm:$0xf]  ;;  %v2599_v12 = vld [vmem:[#allocation2 + $0x90] sm:$0xf0]  ;;  %v1992_v14 = vld [vmem:[#allocation2 + $0xcc] sm:$0xf0]  ;;  %v1878_v16 = vor.u32 %v2573_v5, %v1875_v6  ;;  %v2079_v19 = vor.u32 %v2625_v9, %v2078_v8 }
  0x28   :  { %v2602_v13 = vld [vmem:[#allocation2 + $0xb4] sm:$0xf]  ;;  %v2571_v17 = vld [vmem:[#allocation2 + $0x4] sm:$0xf]  ;;  %v1867_v18 = vld [vmem:[#allocation2 + $0x1c] sm:$0xf0]  ;;  %v1971_v23 = vor.u32 %v2599_v12, %v1970_v10 }
  0x29   :  { %212 = vmatpush.bf16.msra.mxu0 %v1890_v38  ;;  %539 = vmatpush.bf16.msra.mxu3 %v2035_v61  ;;  %v2623_v20 = vld [vmem:[#allocation2 + $0x19c] sm:$0xf]  ;;  %v2058_v21 = vld [vmem:[#allocation2 + $0x160] sm:$0xf]  ;;  %v1995_v24 = vor.u32 %v2602_v13, %v1992_v14  ;;  %v2080_v25 = vld [vmem:[#allocation2 + $0x1b4] sm:$0xf0]  ;;  %v1870_v30 = vor.u32 %v2571_v17, %v1867_v18 }
  0x2a   :  { %527 = vmatpush.bf16.msra.mxu2 %v2011_v57  ;;  %v2620_v22 = vld [vmem:[#allocation2 + $0x178] sm:$0xf0]  ;;  %v1950_v26 = vld [vmem:[#allocation2 + $0x40] sm:$0xf]  ;;  %v1972_v29 = vld [vmem:[#allocation2 + $0x94] sm:$0xf0]  ;;  %v2083_v32 = vor.u32 %v2623_v20, %v2080_v25 }
  0x2b   :  { %225 = vmatpush.bf16.msra.mxu1 %v1894_v55  ;;  %v2594_v27 = vld [vmem:[#allocation2 + $0x58] sm:$0xf0]  ;;  %v2059_v31 = vor.u32 %v2620_v22, %v2058_v21  ;;  %v2618_v33 = vld [vmem:[#allocation2 + $0x164] sm:$0xf]  ;;  %v2038_v34 = vld [vmem:[#allocation2 + $0x128] sm:$0xf] }
  0x2c   :  { %v2597_v28 = vld [vmem:[#allocation2 + $0x7c] sm:$0xf]  ;;  %v2615_v35 = vld [vmem:[#allocation2 + $0x140] sm:$0xf0]  ;;  %v1951_v36 = vor.u32 %v2594_v27, %v1950_v26  ;;  %v2060_v37 = vld [vmem:[#allocation2 + $0x17c] sm:$0xf0] }
  0x2d   :  { %213 = vmatpush.bf16.msra.mxu0 %v1882_v51  ;;  %540 = vmatpush.bf16.msra.mxu3 %v2015_v11  ;;  %v1930_v38 = vld [vmem:[#allocation2 + $0x8] sm:$0xf]  ;;  %v2589_v39 = vld [vmem:[#allocation2 + $0x20] sm:$0xf0]  ;;  %v1975_v40 = vor.u32 %v2597_v28, %v1972_v29  ;;  %v2086_v41 = vld [vmem:[#allocation2 + $0x1a0] sm:$0xf]  ;;  %v2039_v43 = vor.u32 %v2615_v35, %v2038_v34  ;;  %v2063_v44 = vor.u32 %v2618_v33, %v2060_v37 }
  0x2e   :  { %528 = vmatpush.bf16.msra.mxu2 %v1991_v7  ;;  %v2626_v42 = vld [vmem:[#allocation2 + $0x1b8] sm:$0xf0]  ;;  %v2018_v45 = vld [vmem:[#allocation2 + $0xf0] sm:$0xf]  ;;  %v2610_v46 = vld [vmem:[#allocation2 + $0x108] sm:$0xf0]  ;;  %v1931_v47 = vor.u32 %v2589_v39, %v1930_v38 }
  0x2f   :  { %226 = vmatpush.bf16.msra.mxu1 %v1886_v4  ;;  %v2613_v48 = vld [vmem:[#allocation2 + $0x12c] sm:$0xf]  ;;  %v2040_v49 = vld [vmem:[#allocation2 + $0x144] sm:$0xf0]  ;;  %v2087_v50 = vor.u32 %v2626_v42, %v2086_v41  ;;  %v2621_v52 = vld [vmem:[#allocation2 + $0x180] sm:$0xf0]  ;;  %v2019_v53 = vor.u32 %v2610_v46, %v2018_v45 }
  0x30   :  { %v2066_v51 = vld [vmem:[#allocation2 + $0x168] sm:$0xf]  ;;  %v2043_v54 = vor.u32 %v2613_v48, %v2040_v49  ;;  %v1998_v55 = vld [vmem:[#allocation2 + $0xb8] sm:$0xf]  ;;  %v2605_v56 = vld [vmem:[#allocation2 + $0xd0] sm:$0xf0] }
  0x31   :  { %214 = vmatpush.bf16.msra.mxu0 %v1874_v0  ;;  %541 = vmatpush.bf16.msra.mxu3 %v1995_v24  ;;  %v2608_v57 = vld [vmem:[#allocation2 + $0xf4] sm:$0xf]  ;;  %v2020_v58 = vld [vmem:[#allocation2 + $0x10c] sm:$0xf0]  ;;  %v2067_v59 = vor.u32 %v2621_v52, %v2066_v51  ;;  %v1999_v60 = vor.u32 %v2605_v56, %v1998_v55  ;;  %v1978_v62 = vld [vmem:[#allocation2 + $0x80] sm:$0xf] }
  0x32   :  { %529 = vmatpush.bf16.msra.mxu2 %v1971_v23  ;;  %v2023_v61 = vor.u32 %v2608_v57, %v2020_v58  ;;  %v2600_v63 = vld [vmem:[#allocation2 + $0x98] sm:$0xf0]  ;;  %v2000_v0 = vld [vmem:[#allocation2 + $0xd4] sm:$0xf0]  ;;  %v2598_v4 = vld [vmem:[#allocation2 + $0x84] sm:$0xf] }
  0x33   :  { %227 = vmatpush.bf16.msra.mxu1 %v1878_v16  ;;  %v1979_v2 = vor.u32 %v2600_v63, %v1978_v62  ;;  %v1980_v5 = vld [vmem:[#allocation2 + $0x9c] sm:$0xf0]  ;;  %v2592_v7 = vld [vmem:[#allocation2 + $0x44] sm:$0xf]  ;;  %v1958_v9 = vld [vmem:[#allocation2 + $0x48] sm:$0xf] }
  0x34   :  { %v1983_v6 = vor.u32 %v2598_v4, %v1980_v5  ;;  %v1952_v8 = vld [vmem:[#allocation2 + $0x5c] sm:$0xf0]  ;;  %v2595_v11 = vld [vmem:[#allocation2 + $0x60] sm:$0xf0]  ;;  %v2593_v12 = vld [vmem:[#allocation2 + $0x4c] sm:$0xf] }
  0x35   :  { %215 = vmatpush.bf16.msra.mxu0 %v1866_v15  ;;  %542 = vmatpush.bf16.msra.mxu3 %v1975_v40  ;;  %v1955_v10 = vor.u32 %v2592_v7, %v1952_v8  ;;  %v1960_v13 = vld [vmem:[#allocation2 + $0x64] sm:$0xf0]  ;;  %v1959_v14 = vor.u32 %v2595_v11, %v1958_v9  ;;  %v2046_v16 = vld [vmem:[#allocation2 + $0x130] sm:$0xf]  ;;  %v2616_v17 = vld [vmem:[#allocation2 + $0x148] sm:$0xf0] }
  0x36   :  { %530 = vmatpush.bf16.msra.mxu2 %v1951_v36  ;;  %v1963_v15 = vor.u32 %v2593_v12, %v1960_v13  ;;  %v2047_v18 = vor.u32 %v2616_v17, %v2046_v16  ;;  %v1932_v20 = vld [vmem:[#allocation2 + $0x24] sm:$0xf0]  ;;  %v1938_v21 = vld [vmem:[#allocation2 + $0x10] sm:$0xf]  ;;  %v2590_v23 = vld [vmem:[#allocation2 + $0x28] sm:$0xf0] }
  0x37   :  { %228 = vmatpush.bf16.msra.mxu1 %v1870_v30  ;;  %v2588_v24 = vld [vmem:[#allocation2 + $0x14] sm:$0xf]  ;;  %v1940_v25 = vld [vmem:[#allocation2 + $0x2c] sm:$0xf0]  ;;  %v1939_v26 = vor.u32 %v2590_v23, %v1938_v21  ;;  %v2026_v28 = vld [vmem:[#allocation2 + $0xf8] sm:$0xf] }
  0x38   :  { %216 = vmatmul.bf16.vlgmr.msra.gmra.mxu0 %v3018_v1  ;;  %v1943_v27 = vor.u32 %v2588_v24, %v1940_v25  ;;  %v2611_v29 = vld [vmem:[#allocation2 + $0x110] sm:$0xf0]  ;;  %v1986_v34 = vld [vmem:[#allocation2 + $0x88] sm:$0xf]  ;;  %v2601_v35 = vld [vmem:[#allocation2 + $0xa0] sm:$0xf0] }
  0x39   :  { %550 = vmatpush.bf16.msrb.mxu0 %v2079_v19  ;;  %543 = vmatpush.bf16.msra.mxu3 %v1955_v10  ;;  %v2587_v19 = vld [vmem:[#allocation2 + $0xc] sm:$0xf]  ;;  %v2027_v30 = vor.u32 %v2611_v29, %v2026_v28  ;;  %v1987_v36 = vor.u32 %v2601_v35, %v1986_v34  ;;  %v1966_v37 = vld [vmem:[#allocation2 + $0x50] sm:$0xf]  ;;  %v1946_v40 = vld [vmem:[#allocation2 + $0x18] sm:$0xf] }
  0x3a   :  { %229 = vmatmul.bf16.vlgmr.msra.gmra.mxu1 %v3018_v1  ;;  %531 = vmatpush.bf16.msra.mxu2 %v1931_v47  ;;  %v2603_v1 = vld [vmem:[#allocation2 + $0xbc] sm:$0xf]  ;;  %v1935_v22 = vor.u32 %v2587_v19, %v1932_v20  ;;  %v2596_v38 = vld [vmem:[#allocation2 + $0x68] sm:$0xf0]  ;;  %v2591_v41 = vld [vmem:[#allocation2 + $0x30] sm:$0xf0] }
  0x3b   :  { %563 = vmatpush.bf16.msrb.mxu1 %v2083_v32  ;;  %v2003_v3 = vor.u32 %v2603_v1, %v2000_v0  ;;  %v2606_v32 = vld [vmem:[#allocation2 + $0xd8] sm:$0xf0]  ;;  %v1967_v39 = vor.u32 %v2596_v38, %v1966_v37  ;;  %v1947_v42 = vor.u32 %v2591_v41, %v1946_v40 }
  0x3c   :  { %v304_v4 = vld [vmem:[#allocation11 + $0x2] sm:$0x1f] }
  0x3d   :  { %551 = vmatpush.bf16.msrb.mxu0 %v2059_v31  ;;  %544 = vmatpush.bf16.msra.mxu3 %v1935_v22  ;;  %v2006_v31 = vld [vmem:[#allocation2 + $0xc0] sm:$0xf]  ;;  %v308_v5 = vperm.slane %v304_v4, 2  ;;  %v306_v11 = vperm.slane %v304_v4, 0  ;;  %v307_v12 = vperm.slane %v304_v4, 1 }
  0x3e   :  { %576 = vmatpush.bf16.msrb.mxu2 %v2087_v50  ;;  %v2007_v33 = vor.u32 %v2606_v32, %v2006_v31 }
  0x3f   :  { %564 = vmatpush.bf16.msrb.mxu1 %v2063_v44 }
  0x41   :  { %552 = vmatpush.bf16.msrb.mxu0 %v2039_v43  ;;  %v122_v43 = vld [vmem:[#allocation11] sm:$0x3] }
  0x42   :  { %577 = vmatpush.bf16.msrb.mxu2 %v2067_v59  ;;  %v124_v44 = vperm.slane %v122_v43, 0  ;;  %v125_v47 = vperm.slane %v122_v43, 1 }
  0x43   :  { %565 = vmatpush.bf16.msrb.mxu1 %v2043_v54 }
  0x45   :  { %553 = vmatpush.bf16.msrb.mxu0 %v2019_v53 }
  0x46   :  { %578 = vmatpush.bf16.msrb.mxu2 %v2047_v18 }
  0x47   :  { %566 = vmatpush.bf16.msrb.mxu1 %v2023_v61 }
  0x49   :  { %554 = vmatpush.bf16.msrb.mxu0 %v1999_v60 }
  0x4a   :  { %579 = vmatpush.bf16.msrb.mxu2 %v2027_v30 }
  0x4b   :  { %567 = vmatpush.bf16.msrb.mxu1 %v2003_v3 }
  0x4d   :  { %555 = vmatpush.bf16.msrb.mxu0 %v1979_v2 }
  0x4e   :  { %580 = vmatpush.bf16.msrb.mxu2 %v2007_v33 }
  0x4f   :  { %568 = vmatpush.bf16.msrb.mxu1 %v1983_v6  ;;  %v309_v6 = vperm.slane %v304_v4, 3 }
  0x51   :  { %556 = vmatpush.bf16.msrb.mxu0 %v1959_v14 }
  0x52   :  { %581 = vmatpush.bf16.msrb.mxu2 %v1987_v36 }
  0x53   :  { %569 = vmatpush.bf16.msrb.mxu1 %v1963_v15 }
  0x55   :  { %557 = vmatpush.bf16.msrb.mxu0 %v1939_v26 }
  0x56   :  { %582 = vmatpush.bf16.msrb.mxu2 %v1967_v39 }
  0x57   :  { %570 = vmatpush.bf16.msrb.mxu1 %v1943_v27  ;;  %v310_v27 = vperm.slane %v304_v4, 4 }
  0x5a   :  { %583 = vmatpush.bf16.msrb.mxu2 %v1947_v42 }
  0xb5   :  { %v217_v45 = vpop.f32.mrf.mxu0 }
  0xb6   :  { %v218_v46 = vadd.f32 %v217_v45, %v124_v44 }
  0xb7   :  { %v230_v50 = vpop.f32.mrf.mxu1 }
  0xb8   :  { %v234_v48 = vmax.f32 %v218_v46, 0.0  ;;  %v231_v51 = vadd.f32 %v230_v50, %v125_v47 }
  0xba   :  { %v235_v49 = vpack.c.bf16 %v234_v48, %v234_v48  ;;  %v1927_v53 = vmul.f32 -1.442695, %v231_v51 }
  0xbc   :  { %532 = vmatmul.bf16.vlgmr.msra.gmra.mxu2 %v235_v49  ;;  %545 = vmatmul.bf16.vlgmr.msra.gmra.mxu3 %v235_v49  ;;  %2754 = vpow2.f32 %v1927_v53 }
  0xbd   :  { %558 = vmatmul.bf16.vlgmr.msrb.gmra.mxu0 %v235_v49  ;;  %571 = vmatmul.bf16.vlgmr.msrb.gmra.mxu1 %v235_v49  ;;  %v219_v52 = vpop.f32.mrf.mxu0 }
  0xbf   :  { %v232_v54 = vpop.f32.mrf.mxu1 }
  0xc2   :  { %v2755_v55 = vpop.eup %2754 }
  0xc3   :  { %v239_v56 = vadd.f32 1.0, %v2755_v55 }
  0xc5   :  { %2756 = vrcp.f32 %v239_v56  ;;  %v251_v59 = vand.u32 2147483648, %v239_v56  ;;  %vm245_vm0 = vweird.f32 %v239_v56  ;;  %v249_v61 = vand.u32 2147483647, %v239_v56 }
  0xc7   :  { %v252_v63 = vor.u32 1.1754944e-38, %v251_v59  ;;  %vm250_vm3 = vcmp.eq.f32.partialorder %v249_v61, 8.507059e+37 }
  0xcb   :  { %v2757_v57 = vpop.eup %2756 }
  0xcc   :  { %584 = vmatmul.bf16.vlgmr.msrb.gmra.mxu2 %v235_v49  ;;  %v241_v58 = vmul.f32 %v2757_v57, %v239_v56  ;;  %vm246_vm1 = vweird.f32 %v2757_v57 }
  0xcd   :  { %vm247_vm2 = vmor %vm245_vm0, %vm246_vm1 }
  0xce   :  { %v242_v60 = vsub.f32 1.0, %v241_v58 }
  0xd0   :  { %v243_v62 = vmul.f32 %v2757_v57, %v242_v60 }
  0xd2   :  { %v244_v1 = vadd.f32 %v2757_v57, %v243_v62 }
  0xd4   :  { %v248_v0 = vsel %vm247_vm2, %v2757_v57, %v244_v1 }
  0xd5   :  { %v3025_v2 = vsel %vm250_vm3, %v252_v63, %v248_v0 }
  0xd6   :  { %v255_v3 = vpack.c.bf16 %v3025_v2, %v3025_v2 }
 0x13a   :  { %v559_v7 = vpop.f32.mrf.mxu0  ;;  %v572_v8 = vpop.f32.mrf.mxu1 }
 0x13b   :  { %v560_v9 = vadd.f32 %v559_v7, %v308_v5  ;;  %v573_v10 = vadd.f32 %v572_v8, %v309_v6 }
 0x13d   :  { %v591_v13 = vmax.f32 %v560_v9, 0.0  ;;  %v592_v14 = vmax.f32 %v573_v10, 0.0 }
 0x13f   :  { %v3029_v15 = vpack.c.bf16 %v592_v14, %v591_v13  ;;  %v533_v16 = vpop.f32.mrf.mxu2  ;;  %v546_v17 = vpop.f32.mrf.mxu3 }
 0x140   :  { %v534_v18 = vadd.f32 %v533_v16, %v306_v11  ;;  %v547_v19 = vadd.f32 %v546_v17, %v307_v12 }
 0x142   :  { %v589_v20 = vmax.f32 %v534_v18, 0.0  ;;  %v590_v21 = vmax.f32 %v547_v19, 0.0  ;;  %v561_v22 = vpop.f32.mrf.mxu0  ;;  %v574_v23 = vpop.f32.mrf.mxu1 }
 0x144   :  { %v3031_v24 = vpack.c.bf16 %v590_v21, %v589_v20 }
 0x147   :  { %v535_v25 = vpop.f32.mrf.mxu2  ;;  %v548_v26 = vpop.f32.mrf.mxu3 }
 0x14f   :  { %v585_v28 = vpop.f32.mrf.mxu2 }
 0x150   :  { %v586_v29 = vadd.f32 %v585_v28, %v310_v27 }
 0x152   :  { %v593_v30 = vmax.f32 %v586_v29, 0.0 }
 0x154   :  { %v3033_v31 = vpack.c.bf16 %v593_v30, %v593_v30 }
 0x157   :  { %v587_v32 = vpop.f32.mrf.mxu2 }
 0x158   :  { %2951 = dma.done.wait [#allocation7 + $0x1], 6144 }
 0x159   :  { %2952 = vsyncadd [#allocation7 + $0x1], 4294961152  ;;  %v2150_v33 = vld [vmem:[#allocation3 + $0x154] sm:$0xf]  ;;  %v2642_v34 = vld [vmem:[#allocation3 + $0x168] sm:$0xf0] }
 0x15a   :  { %v2182_v35 = vld [vmem:[#allocation3 + $0x158] sm:$0xf]  ;;  %v2151_v36 = vor.u32 %v2642_v34, %v2150_v33  ;;  %v2650_v37 = vld [vmem:[#allocation3 + $0x16c] sm:$0xf0]  ;;  %v2146_v38 = vld [vmem:[#allocation3 + $0x124] sm:$0xf] }
 0x15b   :  { %v2641_v39 = vld [vmem:[#allocation3 + $0x138] sm:$0xf0]  ;;  %v2183_v40 = vor.u32 %v2650_v37, %v2182_v35  ;;  %v2178_v41 = vld [vmem:[#allocation3 + $0x128] sm:$0xf]  ;;  %v2649_v42 = vld [vmem:[#allocation3 + $0x13c] sm:$0xf0] }
 0x15c   :  { %756 = vmatpush.bf16.msra.mxu0 %v2151_v36  ;;  %v2147_v43 = vor.u32 %v2641_v39, %v2146_v38  ;;  %v2179_v44 = vor.u32 %v2649_v42, %v2178_v41  ;;  %v2142_v45 = vld [vmem:[#allocation3 + $0xf4] sm:$0xf]  ;;  %v2640_v46 = vld [vmem:[#allocation3 + $0x108] sm:$0xf0]  ;;  %v2174_v47 = vld [vmem:[#allocation3 + $0xf8] sm:$0xf]  ;;  %v705_v39 = vunpack.c.h.b16 %v3031_v24 }
 0x15d   :  { %844 = vmatpush.bf16.msra.mxu1 %v2183_v40  ;;  %v2648_v48 = vld [vmem:[#allocation3 + $0x10c] sm:$0xf0]  ;;  %v2143_v49 = vor.u32 %v2640_v46, %v2142_v45  ;;  %v2138_v51 = vld [vmem:[#allocation3 + $0xc4] sm:$0xf]  ;;  %v2639_v52 = vld [vmem:[#allocation3 + $0xd8] sm:$0xf0] }
 0x15e   :  { %v2175_v50 = vor.u32 %v2648_v48, %v2174_v47  ;;  %v2170_v53 = vld [vmem:[#allocation3 + $0xc8] sm:$0xf]  ;;  %v2647_v54 = vld [vmem:[#allocation3 + $0xdc] sm:$0xf0]  ;;  %v2118_v55 = vld [vmem:[#allocation3 + $0x150] sm:$0xf]  ;;  %v2139_v56 = vor.u32 %v2639_v52, %v2138_v51  ;;  %v706_v51 = vpack.c.b16 %v705_v39, %v705_v39 }
 0x15f   :  { %v2634_v57 = vld [vmem:[#allocation3 + $0x164] sm:$0xf0]  ;;  %v2114_v58 = vld [vmem:[#allocation3 + $0x120] sm:$0xf]  ;;  %v2633_v59 = vld [vmem:[#allocation3 + $0x134] sm:$0xf0]  ;;  %v2171_v60 = vor.u32 %v2647_v54, %v2170_v53 }
 0x160   :  { %757 = vmatpush.bf16.msra.mxu0 %v2147_v43  ;;  %v2134_v61 = vld [vmem:[#allocation3 + $0x94] sm:$0xf]  ;;  %v2638_v62 = vld [vmem:[#allocation3 + $0xa8] sm:$0xf0]  ;;  %v2119_v63 = vor.u32 %v2634_v57, %v2118_v55  ;;  %v2166_v1 = vld [vmem:[#allocation3 + $0x98] sm:$0xf]  ;;  %v2115_v4 = vor.u32 %v2633_v59, %v2114_v58 }
 0x161   :  { %845 = vmatpush.bf16.msra.mxu1 %v2179_v44  ;;  %v2646_v0 = vld [vmem:[#allocation3 + $0xac] sm:$0xf0]  ;;  %v2135_v5 = vor.u32 %v2638_v62, %v2134_v61  ;;  %v2632_v7 = vld [vmem:[#allocation3 + $0x104] sm:$0xf0]  ;;  %v2130_v9 = vld [vmem:[#allocation3 + $0x64] sm:$0xf] }
 0x162   :  { %668 = vmatpush.bf16.msrb.mxu3 %v2119_v63  ;;  %v2110_v6 = vld [vmem:[#allocation3 + $0xf0] sm:$0xf]  ;;  %v2167_v8 = vor.u32 %v2646_v0, %v2166_v1  ;;  %v2637_v10 = vld [vmem:[#allocation3 + $0x78] sm:$0xf0]  ;;  %v2162_v11 = vld [vmem:[#allocation3 + $0x68] sm:$0xf] }
 0x163   :  { %v2645_v12 = vld [vmem:[#allocation3 + $0x7c] sm:$0xf0]  ;;  %v2111_v13 = vor.u32 %v2632_v7, %v2110_v6  ;;  %v2131_v16 = vor.u32 %v2637_v10, %v2130_v9  ;;  %v2631_v17 = vld [vmem:[#allocation3 + $0xd4] sm:$0xf0]  ;;  %v2126_v19 = vld [vmem:[#allocation3 + $0x34] sm:$0xf] }
 0x164   :  { %758 = vmatpush.bf16.msra.mxu0 %v2143_v49  ;;  %v2106_v14 = vld [vmem:[#allocation3 + $0xc0] sm:$0xf]  ;;  %v2163_v18 = vor.u32 %v2645_v12, %v2162_v11  ;;  %v2636_v20 = vld [vmem:[#allocation3 + $0x48] sm:$0xf0]  ;;  %v2158_v21 = vld [vmem:[#allocation3 + $0x38] sm:$0xf] }
 0x165   :  { %846 = vmatpush.bf16.msra.mxu1 %v2175_v50  ;;  %v2644_v22 = vld [vmem:[#allocation3 + $0x4c] sm:$0xf0]  ;;  %v2122_v23 = vld [vmem:[#allocation3 + $0x4] sm:$0xf]  ;;  %v2107_v25 = vor.u32 %v2631_v17, %v2106_v14  ;;  %v2127_v26 = vor.u32 %v2636_v20, %v2126_v19  ;;  %v2635_v27 = vld [vmem:[#allocation3 + $0x18] sm:$0xf0] }
 0x166   :  { %669 = vmatpush.bf16.msrb.mxu3 %v2115_v4  ;;  %v2102_v28 = vld [vmem:[#allocation3 + $0x90] sm:$0xf]  ;;  %v2630_v29 = vld [vmem:[#allocation3 + $0xa4] sm:$0xf0]  ;;  %v2159_v30 = vor.u32 %v2644_v22, %v2158_v21  ;;  %v2214_v33 = vld [vmem:[#allocation3 + $0x15c] sm:$0xf]  ;;  %v2123_v41 = vor.u32 %v2635_v27, %v2122_v23 }
 0x167   :  { %v2154_v32 = vld [vmem:[#allocation3 + $0x8] sm:$0xf]  ;;  %v2658_v34 = vld [vmem:[#allocation3 + $0x170] sm:$0xf0]  ;;  %v2643_v35 = vld [vmem:[#allocation3 + $0x1c] sm:$0xf0]  ;;  %v2103_v40 = vor.u32 %v2630_v29, %v2102_v28 }
 0x168   :  { %759 = vmatpush.bf16.msra.mxu0 %v2139_v56  ;;  %v2278_v36 = vld [vmem:[#allocation3 + $0x164] sm:$0xf]  ;;  %v2674_v37 = vld [vmem:[#allocation3 + $0x178] sm:$0xf0]  ;;  %v2215_v38 = vor.u32 %v2658_v34, %v2214_v33  ;;  %v2098_v42 = vld [vmem:[#allocation3 + $0x60] sm:$0xf]  ;;  %v2155_v44 = vor.u32 %v2643_v35, %v2154_v32 }
 0x169   :  { %847 = vmatpush.bf16.msra.mxu1 %v2171_v60  ;;  %v2629_v43 = vld [vmem:[#allocation3 + $0x74] sm:$0xf0]  ;;  %v2279_v45 = vor.u32 %v2674_v37, %v2278_v36  ;;  %v2210_v46 = vld [vmem:[#allocation3 + $0x12c] sm:$0xf]  ;;  %v2657_v47 = vld [vmem:[#allocation3 + $0x140] sm:$0xf0] }
 0x16a   :  { %670 = vmatpush.bf16.msrb.mxu3 %v2111_v13  ;;  %936 = vmatpush.bf16.msra.mxu2 %v2215_v38  ;;  %v2274_v48 = vld [vmem:[#allocation3 + $0x134] sm:$0xf]  ;;  %v2673_v49 = vld [vmem:[#allocation3 + $0x148] sm:$0xf0]  ;;  %v2211_v50 = vor.u32 %v2657_v47, %v2210_v46  ;;  %v2099_v52 = vor.u32 %v2629_v43, %v2098_v42  ;;  %v2094_v53 = vld [vmem:[#allocation3 + $0x30] sm:$0xf]  ;;  %v885_v43 = vunpack.c.h.b16 %v3029_v15 }
 0x16b   :  { %v2628_v54 = vld [vmem:[#allocation3 + $0x44] sm:$0xf0]  ;;  %v2206_v55 = vld [vmem:[#allocation3 + $0xfc] sm:$0xf]  ;;  %v2656_v56 = vld [vmem:[#allocation3 + $0x110] sm:$0xf0]  ;;  %v2275_v57 = vor.u32 %v2673_v49, %v2274_v48 }
 0x16c   :  { %760 = vmatpush.bf16.msra.mxu0 %v2135_v5  ;;  %v2207_v58 = vor.u32 %v2656_v56, %v2206_v55  ;;  %v2202_v59 = vld [vmem:[#allocation3 + $0xcc] sm:$0xf]  ;;  %v2655_v60 = vld [vmem:[#allocation3 + $0xe0] sm:$0xf0]  ;;  %v2672_v62 = vld [vmem:[#allocation3 + $0x118] sm:$0xf0]  ;;  %v2095_v63 = vor.u32 %v2628_v54, %v2094_v53 }
 0x16d   :  { %848 = vmatpush.bf16.msra.mxu1 %v2167_v8  ;;  %v2270_v61 = vld [vmem:[#allocation3 + $0x104] sm:$0xf]  ;;  %v2090_v1 = vld [vmem:[#allocation3] sm:$0xf]  ;;  %v2627_v0 = vld [vmem:[#allocation3 + $0x14] sm:$0xf0]  ;;  %v2203_v5 = vor.u32 %v2655_v60, %v2202_v59 }
 0x16e   :  { %671 = vmatpush.bf16.msrb.mxu3 %v2107_v25  ;;  %937 = vmatpush.bf16.msra.mxu2 %v2211_v50  ;;  %v2246_v4 = vld [vmem:[#allocation3 + $0x160] sm:$0xf]  ;;  %v2271_v6 = vor.u32 %v2672_v62, %v2270_v61  ;;  %v2666_v7 = vld [vmem:[#allocation3 + $0x174] sm:$0xf0]  ;;  %v2198_v8 = vld [vmem:[#allocation3 + $0x9c] sm:$0xf]  ;;  %v2091_v12 = vor.u32 %v2627_v0, %v2090_v1  ;;  %v886_v50 = vpack.c.b16 %v885_v43, %v885_v43 }
 0x16f   :  { %v2654_v9 = vld [vmem:[#allocation3 + $0xb0] sm:$0xf0]  ;;  %v2671_v11 = vld [vmem:[#allocation3 + $0xe8] sm:$0xf0]  ;;  %v2247_v13 = vor.u32 %v2666_v7, %v2246_v4  ;;  %v2242_v14 = vld [vmem:[#allocation3 + $0x130] sm:$0xf] }
 0x170   :  { %761 = vmatpush.bf16.msra.mxu0 %v2131_v16  ;;  %v2266_v10 = vld [vmem:[#allocation3 + $0xd4] sm:$0xf]  ;;  %v2199_v16 = vor.u32 %v2654_v9, %v2198_v8  ;;  %v2194_v19 = vld [vmem:[#allocation3 + $0x6c] sm:$0xf]  ;;  %v2653_v20 = vld [vmem:[#allocation3 + $0x80] sm:$0xf0] }
 0x171   :  { %849 = vmatpush.bf16.msra.mxu1 %v2163_v18  ;;  %v2267_v17 = vor.u32 %v2671_v11, %v2266_v10  ;;  %v2665_v18 = vld [vmem:[#allocation3 + $0x144] sm:$0xf0]  ;;  %v2262_v21 = vld [vmem:[#allocation3 + $0xa4] sm:$0xf]  ;;  %v2670_v22 = vld [vmem:[#allocation3 + $0xb8] sm:$0xf0] }
 0x172   :  { %672 = vmatpush.bf16.msrb.mxu3 %v2103_v40  ;;  %938 = vmatpush.bf16.msra.mxu2 %v2207_v58  ;;  %v2243_v23 = vor.u32 %v2665_v18, %v2242_v14  ;;  %v2238_v25 = vld [vmem:[#allocation3 + $0x100] sm:$0xf]  ;;  %v2263_v27 = vor.u32 %v2670_v22, %v2262_v21  ;;  %v2664_v28 = vld [vmem:[#allocation3 + $0x114] sm:$0xf0]  ;;  %v2190_v29 = vld [vmem:[#allocation3 + $0x3c] sm:$0xf] }
 0x173   :  { %v2258_v32 = vld [vmem:[#allocation3 + $0x74] sm:$0xf]  ;;  %v2669_v33 = vld [vmem:[#allocation3 + $0x88] sm:$0xf0]  ;;  %v2239_v34 = vor.u32 %v2664_v28, %v2238_v25  ;;  %v2234_v35 = vld [vmem:[#allocation3 + $0xd0] sm:$0xf] }
 0x174   :  { %762 = vmatpush.bf16.msra.mxu0 %v2127_v26  ;;  %v2195_v26 = vor.u32 %v2653_v20, %v2194_v19  ;;  %v2259_v37 = vor.u32 %v2669_v33, %v2258_v32  ;;  %v2663_v38 = vld [vmem:[#allocation3 + $0xe4] sm:$0xf0]  ;;  %v2186_v39 = vld [vmem:[#allocation3 + $0xc] sm:$0xf]  ;;  %v2651_v40 = vld [vmem:[#allocation3 + $0x20] sm:$0xf0] }
 0x175   :  { %850 = vmatpush.bf16.msra.mxu1 %v2159_v30  ;;  %v2652_v30 = vld [vmem:[#allocation3 + $0x50] sm:$0xf0]  ;;  %v2668_v42 = vld [vmem:[#allocation3 + $0x58] sm:$0xf0]  ;;  %v2230_v46 = vld [vmem:[#allocation3 + $0xa0] sm:$0xf] }
 0x176   :  { %673 = vmatpush.bf16.msrb.mxu3 %v2099_v52  ;;  %939 = vmatpush.bf16.msra.mxu2 %v2203_v5  ;;  %v2191_v36 = vor.u32 %v2652_v30, %v2190_v29  ;;  %v2662_v47 = vld [vmem:[#allocation3 + $0xb4] sm:$0xf0]  ;;  %v2250_v48 = vld [vmem:[#allocation3 + $0x14] sm:$0xf]  ;;  %v2667_v49 = vld [vmem:[#allocation3 + $0x28] sm:$0xf0] }
 0x177   :  { %v2251_v52 = vor.u32 %v2667_v49, %v2250_v48  ;;  %v2226_v53 = vld [vmem:[#allocation3 + $0x70] sm:$0xf]  ;;  %v2661_v54 = vld [vmem:[#allocation3 + $0x84] sm:$0xf0]  ;;  %v2222_v55 = vld [vmem:[#allocation3 + $0x40] sm:$0xf] }
 0x178   :  { %763 = vmatpush.bf16.msra.mxu0 %v2123_v41  ;;  %v2254_v41 = vld [vmem:[#allocation3 + $0x44] sm:$0xf]  ;;  %v2660_v56 = vld [vmem:[#allocation3 + $0x54] sm:$0xf0]  ;;  %v2218_v58 = vld [vmem:[#allocation3 + $0x10] sm:$0xf] }
 0x179   :  { %851 = vmatpush.bf16.msra.mxu1 %v2155_v44  ;;  %v2235_v44 = vor.u32 %v2663_v38, %v2234_v35  ;;  %v2659_v59 = vld [vmem:[#allocation3 + $0x24] sm:$0xf0]  ;;  %v2758_v61 = vld [vmem:[#allocation11 + $0x8] ss:$0 sm:$0xff]  ;;  %v2759_v1 = vld [vmem:[#allocation11 + $0x9] ss:$0 sm:$0xff] }
 0x17a   :  { %674 = vmatpush.bf16.msrb.mxu3 %v2095_v63  ;;  %940 = vmatpush.bf16.msra.mxu2 %v2199_v16  ;;  %v2219_v60 = vor.u32 %v2659_v59, %v2218_v58  ;;  %s2965_s4 = smov 32   ;;  %s2966_s5 = smov 64   ;;  %v2760_v7 = vld [vmem:[#allocation11 + $0xc] ss:$0 sm:$0xff]  ;;  %vm682_vm4 = vcmask 261120   ;;  %vm1134_vm9 = vcmask 523264  }
 0x17b   :  { %764 = vmatmul.bf16.vlgmr.msra.gmra.mxu0 %v706_v51  ;;  %v2231_v51 = vor.u32 %v2662_v47, %v2230_v46  ;;  %vm774_vm10 = vcmask 523520   ;;  %vm862_vm11 = vcmask 1048064  }
 0x17c   :  { %1102 = vmatpush.bf16.msrb.mxu0 %v2279_v45  ;;  %852 = vmatmul.bf16.vlgmr.msra.gmra.mxu1 %v3029_v15  ;;  %v2187_v45 = vor.u32 %v2651_v40, %v2186_v39  ;;  %v2227_v15 = vor.u32 %v2661_v54, %v2226_v53 }
 0x17e   :  { %675 = vmatpush.bf16.msrb.mxu3 %v2091_v12  ;;  %941 = vmatpush.bf16.msra.mxu2 %v2195_v26  ;;  %v2762_v12 = vld [vmem:[#allocation11 + $0xa] ss:$0 sm:$0xff] }
 0x180   :  { %1103 = vmatpush.bf16.msrb.mxu0 %v2275_v57  ;;  %v2223_v57 = vor.u32 %v2660_v56, %v2222_v55 }
 0x181   :  { %676 = vmatmul.bf16.vlgmr.msrb.gmra.mxu3 %v3031_v24  ;;  %v2255_v24 = vor.u32 %v2668_v42, %v2254_v41 }
 0x182   :  { %1019 = vmatpush.bf16.msra.mxu3 %v2247_v13  ;;  %942 = vmatpush.bf16.msra.mxu2 %v2191_v36 }
 0x184   :  { %1104 = vmatpush.bf16.msrb.mxu0 %v2271_v6 }
 0x186   :  { %1020 = vmatpush.bf16.msra.mxu3 %v2243_v23  ;;  %943 = vmatpush.bf16.msra.mxu2 %v2187_v45 }
 0x188   :  { %1105 = vmatpush.bf16.msrb.mxu0 %v2267_v17 }
 0x189   :  { %944 = vmatmul.bf16.vlgmr.msra.gmra.mxu2 %v886_v50 }
 0x18a   :  { %1021 = vmatpush.bf16.msra.mxu3 %v2239_v34 }
 0x18c   :  { %1106 = vmatpush.bf16.msrb.mxu0 %v2263_v27  ;;  %v2763_v27 = vld [vmem:[#allocation11 + $0xb] ss:$0 sm:$0xff] }
 0x18e   :  { %1022 = vmatpush.bf16.msra.mxu3 %v2235_v44 }
 0x190   :  { %1107 = vmatpush.bf16.msrb.mxu0 %v2259_v37 }
 0x192   :  { %1023 = vmatpush.bf16.msra.mxu3 %v2231_v51 }
 0x194   :  { %1108 = vmatpush.bf16.msrb.mxu0 %v2255_v24 }
 0x196   :  { %1024 = vmatpush.bf16.msra.mxu3 %v2227_v15 }
 0x198   :  { %1109 = vmatpush.bf16.msrb.mxu0 %v2251_v52 }
 0x19a   :  { %1025 = vmatpush.bf16.msra.mxu3 %v2223_v57 }
 0x19b   :  { %1110 = vmatmul.bf16.vlgmr.msrb.gmra.mxu0 %v255_v3 }
 0x19e   :  { %1026 = vmatpush.bf16.msra.mxu3 %v2219_v60 }
 0x1a1   :  { %1027 = vmatmul.bf16.vlgmr.msra.gmra.mxu3 %v3033_v31  ;;  %v2761_v31 = vld [vmem:[#allocation11 + $0x7] ss:$0 sm:$0xff] }
 0x1f8   :  { %v765_v62 = vpop.f32.mrf.mxu0 }
 0x1f9   :  { %v766_v63 = vadd.f32 %v2758_v61, %v765_v62  ;;  %v853_v0 = vpop.f32.mrf.mxu1 }
 0x1fa   :  { %v854_v5 = vadd.f32 %v2759_v1, %v853_v0 }
 0x1fb   :  { %v769_v4 = vmax.f32 %v766_v63, 0.0 }
 0x1fc   :  { %v857_v3 = vmax.f32 %v854_v5, 0.0 }
 0x1fd   :  { %771 = vrot.lane.b32.xlu0 %v769_v4, %s2965_s4 }
 0x200   :  { %v767_v2 = vpop.f32.mrf.mxu0 }
 0x201   :  { %v855_v6 = vpop.f32.mrf.mxu1 }
 0x204   :  { %v677_v11 = vpop.f32.mrf.mxu3 }
 0x205   :  { %859 = vrot.lane.b32.xlu0 %v857_v3, %s2966_s5  ;;  %v678_v16 = vadd.f32 %v2761_v31, %v677_v11 }
 0x207   :  { %v681_v19 = vmax.f32 %v678_v16, 0.0 }
 0x209   :  { %683 = vst.msk [vmem:[#allocation6] sm:$0xff] %vm682_vm4, %v681_v19 }
 0x20c   :  { %v945_v13 = vpop.f32.mrf.mxu2  ;;  %v679_v23 = vpop.f32.mrf.mxu3 }
 0x20d   :  { %v946_v17 = vadd.f32 %v2762_v12, %v945_v13 }
 0x20f   :  { %v949_v20 = vmax.f32 %v946_v17, 0.0 }
 0x211   :  { %v3043_v22 = vpack.c.bf16 %v949_v20, %v949_v20 }
 0x214   :  { %v947_v25 = vpop.f32.mrf.mxu2 }
 0x218   :  { %v1111_v8 = vpop.f32.mrf.mxu0 }
 0x219   :  { %v1112_v9 = vadd.f32 %v2760_v7, %v1111_v8 }
 0x21b   :  { %v2280_v10 = vmul.f32 -1.442695, %v1112_v9 }
 0x21d   :  { %2764 = vpow2.f32 %v2280_v10 }
 0x220   :  { %v1113_v14 = vpop.f32.mrf.mxu0 }
 0x223   :  { %v2765_v18 = vpop.eup %2764 }
 0x224   :  { %v1118_v21 = vadd.f32 1.0, %v2765_v18  ;;  %v1028_v33 = vpop.f32.mrf.mxu3 }
 0x225   :  { %v1029_v34 = vadd.f32 %v2763_v27, %v1028_v33 }
 0x226   :  { %2766 = vrcp.f32 %v1118_v21  ;;  %v1130_v29 = vand.u32 2147483648, %v1118_v21  ;;  %vm1124_vm5 = vweird.f32 %v1118_v21  ;;  %v1128_v32 = vand.u32 2147483647, %v1118_v21 }
 0x227   :  { %v1032_v37 = vmax.f32 %v1029_v34, 0.0 }
 0x228   :  { %v1131_v36 = vor.u32 1.1754944e-38, %v1130_v29  ;;  %vm1129_vm8 = vcmp.eq.f32.partialorder %v1128_v32, 8.507059e+37 }
 0x229   :  { %v3045_v39 = vpack.c.bf16 %v1032_v37, %v1032_v37 }
 0x22c   :  { %v2767_v26 = vpop.eup %2766  ;;  %v1030_v42 = vpop.f32.mrf.mxu3 }
 0x22d   :  { %v1120_v28 = vmul.f32 %v2767_v26, %v1118_v21  ;;  %vm1125_vm6 = vweird.f32 %v2767_v26 }
 0x22e   :  { %vm1126_vm7 = vmor %vm1124_vm5, %vm1125_vm6 }
 0x22f   :  { %v1121_v30 = vsub.f32 1.0, %v1120_v28 }
 0x231   :  { %v1122_v35 = vmul.f32 %v2767_v26, %v1121_v30 }
 0x233   :  { %v1123_v38 = vadd.f32 %v2767_v26, %v1122_v35 }
 0x235   :  { %v1127_v40 = vsel %vm1126_vm7, %v2767_v26, %v1123_v38 }
 0x236   :  { %v1132_v41 = vsel %vm1129_vm8, %v1131_v36, %v1127_v40 }
 0x237   :  { %1135 = vst.msk [vmem:[#allocation6 + $0x18] sm:$0xff] %vm1134_vm9, %v1132_v41 }
 0x23e   :  { %v1139_v43 = vld [vmem:[#allocation6 + $0x18] sm:$0xff] }
 0x23f   :  { %v3048_v44 = vpack.c.bf16 %v1139_v43, %v1139_v43 }
 0x26f   :  { %v772_v45 = vpop.permute.xlu0 %771 }
 0x270   :  { %775 = vst.msk [vmem:[#allocation6] sm:$0xff] %vm774_vm10, %v772_v45 }
 0x277   :  { %v860_v24 = vpop.permute.xlu0 %859 }
 0x278   :  { %863 = vst.msk [vmem:[#allocation6] sm:$0xff] %vm862_vm11, %v860_v24 }
 0x27f   :  { %v1136_v46 = vld [vmem:[#allocation6] sm:$0xff] }
 0x280   :  { %v3050_v47 = vpack.c.bf16 %v1136_v46, %v1136_v46 }
 0x281   :  { %2953 = dma.done.wait [#allocation7 + $0x2], 7168 }
 0x282   :  { %2954 = vsyncadd [#allocation7 + $0x2], 4294960128  ;;  %v2403_v48 = vld [vmem:[#allocation4 + $0xf0] sm:$0xf]  ;;  %v2706_v49 = vld [vmem:[#allocation4 + $0xf4] sm:$0xf0] }
 0x283   :  { %v2395_v50 = vld [vmem:[#allocation4 + $0xe0] sm:$0xf]  ;;  %v2404_v51 = vor.u32 %v2706_v49, %v2403_v48  ;;  %v2704_v52 = vld [vmem:[#allocation4 + $0xe4] sm:$0xf0]  ;;  %v2467_v53 = vld [vmem:[#allocation4 + $0x170] sm:$0xf] }
 0x284   :  { %v2722_v54 = vld [vmem:[#allocation4 + $0x174] sm:$0xf0]  ;;  %v2339_v55 = vld [vmem:[#allocation4 + $0x70] sm:$0xf]  ;;  %v2396_v56 = vor.u32 %v2704_v52, %v2395_v50  ;;  %v2459_v58 = vld [vmem:[#allocation4 + $0x160] sm:$0xf] }
 0x285   :  { %v2468_v15 = vor.u32 %v2722_v54, %v2467_v53  ;;  %1506 = vmatpush.bf16.msrb.mxu2 %v2404_v51  ;;  %v2690_v57 = vld [vmem:[#allocation4 + $0x74] sm:$0xf0]  ;;  %v2720_v59 = vld [vmem:[#allocation4 + $0x164] sm:$0xf0]  ;;  %v2387_v60 = vld [vmem:[#allocation4 + $0xd0] sm:$0xf] }
 0x286   :  { %v2702_v61 = vld [vmem:[#allocation4 + $0xd4] sm:$0xf0]  ;;  %v2340_v62 = vor.u32 %v2690_v57, %v2339_v55  ;;  %v2460_v63 = vor.u32 %v2720_v59, %v2459_v58  ;;  %v2331_v1 = vld [vmem:[#allocation4 + $0x60] sm:$0xf]  ;;  %v2688_v0 = vld [vmem:[#allocation4 + $0x64] sm:$0xf0] }
 0x287   :  { %1519 = vmatpush.bf16.msrb.mxu3 %v2468_v15  ;;  %v2451_v4 = vld [vmem:[#allocation4 + $0x150] sm:$0xf]  ;;  %v2718_v5 = vld [vmem:[#allocation4 + $0x154] sm:$0xf0]  ;;  %v2332_v2 = vor.u32 %v2688_v0, %v2331_v1  ;;  %v2388_v3 = vor.u32 %v2702_v61, %v2387_v60  ;;  %v2379_v8 = vld [vmem:[#allocation4 + $0xc0] sm:$0xf] }
 0x288   :  { %1493 = vmatpush.bf16.msrb.mxu1 %v2340_v62  ;;  %v2323_v6 = vld [vmem:[#allocation4 + $0x50] sm:$0xf]  ;;  %v2686_v7 = vld [vmem:[#allocation4 + $0x54] sm:$0xf0]  ;;  %v2700_v9 = vld [vmem:[#allocation4 + $0xc4] sm:$0xf0]  ;;  %v2452_v10 = vor.u32 %v2718_v5, %v2451_v4 }
 0x289   :  { %1507 = vmatpush.bf16.msrb.mxu2 %v2396_v56  ;;  %v2443_v31 = vld [vmem:[#allocation4 + $0x140] sm:$0xf]  ;;  %v2716_v11 = vld [vmem:[#allocation4 + $0x144] sm:$0xf0]  ;;  %v2324_v12 = vor.u32 %v2686_v7, %v2323_v6  ;;  %v2380_v13 = vor.u32 %v2700_v9, %v2379_v8  ;;  %v2371_v17 = vld [vmem:[#allocation4 + $0xb0] sm:$0xf] }
 0x28a   :  { %v2315_v14 = vld [vmem:[#allocation4 + $0x40] sm:$0xf]  ;;  %v2684_v16 = vld [vmem:[#allocation4 + $0x44] sm:$0xf0]  ;;  %v2698_v18 = vld [vmem:[#allocation4 + $0xb4] sm:$0xf0]  ;;  %v2444_v19 = vor.u32 %v2716_v11, %v2443_v31 }
 0x28b   :  { %1520 = vmatpush.bf16.msrb.mxu3 %v2460_v63  ;;  %v2435_v20 = vld [vmem:[#allocation4 + $0x130] sm:$0xf]  ;;  %v2714_v21 = vld [vmem:[#allocation4 + $0x134] sm:$0xf0]  ;;  %v2316_v23 = vor.u32 %v2684_v16, %v2315_v14  ;;  %v2372_v25 = vor.u32 %v2698_v18, %v2371_v17  ;;  %v2363_v28 = vld [vmem:[#allocation4 + $0xa0] sm:$0xf] }
 0x28c   :  { %1494 = vmatpush.bf16.msrb.mxu1 %v2332_v2  ;;  %v2307_v26 = vld [vmem:[#allocation4 + $0x30] sm:$0xf]  ;;  %v2682_v27 = vld [vmem:[#allocation4 + $0x34] sm:$0xf0]  ;;  %v2696_v29 = vld [vmem:[#allocation4 + $0xa4] sm:$0xf0]  ;;  %v2436_v30 = vor.u32 %v2714_v21, %v2435_v20 }
 0x28d   :  { %1508 = vmatpush.bf16.msrb.mxu2 %v2388_v3  ;;  %v2427_v32 = vld [vmem:[#allocation4 + $0x120] sm:$0xf]  ;;  %v2712_v33 = vld [vmem:[#allocation4 + $0x124] sm:$0xf0]  ;;  %v2308_v34 = vor.u32 %v2682_v27, %v2307_v26  ;;  %v2364_v35 = vor.u32 %v2696_v29, %v2363_v28  ;;  %v2355_v38 = vld [vmem:[#allocation4 + $0x90] sm:$0xf] }
 0x28e   :  { %v2299_v36 = vld [vmem:[#allocation4 + $0x20] sm:$0xf]  ;;  %v2680_v37 = vld [vmem:[#allocation4 + $0x24] sm:$0xf0]  ;;  %v2694_v40 = vld [vmem:[#allocation4 + $0x94] sm:$0xf0]  ;;  %v2428_v41 = vor.u32 %v2712_v33, %v2427_v32 }
 0x28f   :  { %1521 = vmatpush.bf16.msrb.mxu3 %v2452_v10  ;;  %v2419_v42 = vld [vmem:[#allocation4 + $0x110] sm:$0xf]  ;;  %v2710_v43 = vld [vmem:[#allocation4 + $0x114] sm:$0xf0]  ;;  %v2300_v45 = vor.u32 %v2680_v37, %v2299_v36  ;;  %v2356_v24 = vor.u32 %v2694_v40, %v2355_v38  ;;  %v2347_v49 = vld [vmem:[#allocation4 + $0x80] sm:$0xf] }
 0x290   :  { %1495 = vmatpush.bf16.msrb.mxu1 %v2324_v12  ;;  %v2291_v46 = vld [vmem:[#allocation4 + $0x10] sm:$0xf]  ;;  %v2678_v48 = vld [vmem:[#allocation4 + $0x14] sm:$0xf0]  ;;  %v2692_v50 = vld [vmem:[#allocation4 + $0x84] sm:$0xf0]  ;;  %v2420_v52 = vor.u32 %v2710_v43, %v2419_v42 }
 0x291   :  { %1509 = vmatpush.bf16.msrb.mxu2 %v2380_v13  ;;  %v2499_v51 = vld [vmem:[#allocation4 + $0x1b0] sm:$0xf]  ;;  %v2730_v53 = vld [vmem:[#allocation4 + $0x1b4] sm:$0xf0]  ;;  %v2411_v54 = vld [vmem:[#allocation4 + $0x100] sm:$0xf]  ;;  %v2292_v55 = vor.u32 %v2678_v48, %v2291_v46  ;;  %v2348_v58 = vor.u32 %v2692_v50, %v2347_v49 }
 0x292   :  { %v2708_v15 = vld [vmem:[#allocation4 + $0x104] sm:$0xf0]  ;;  %v2721_v56 = vld [vmem:[#allocation4 + $0x174] sm:$0xf]  ;;  %v2469_v57 = vld [vmem:[#allocation4 + $0x178] sm:$0xf0]  ;;  %v2500_v61 = vor.u32 %v2730_v53, %v2499_v51 }
 0x293   :  { %1522 = vmatpush.bf16.msrb.mxu3 %v2444_v19  ;;  %v2283_v59 = vld [vmem:[#allocation4] sm:$0xf]  ;;  %v2676_v60 = vld [vmem:[#allocation4 + $0x4] sm:$0xf0]  ;;  %v2412_v62 = vor.u32 %v2708_v15, %v2411_v54  ;;  %v2689_v63 = vld [vmem:[#allocation4 + $0x74] sm:$0xf]  ;;  %v2472_v5 = vor.u32 %v2721_v56, %v2469_v57 }
 0x294   :  { %1496 = vmatpush.bf16.msrb.mxu1 %v2316_v23  ;;  %v2341_v1 = vld [vmem:[#allocation4 + $0x78] sm:$0xf0]  ;;  %v2491_v0 = vld [vmem:[#allocation4 + $0x1a0] sm:$0xf]  ;;  %v2728_v4 = vld [vmem:[#allocation4 + $0x1a4] sm:$0xf0]  ;;  %v2284_v2 = vor.u32 %v2676_v60, %v2283_v59 }
 0x295   :  { %1510 = vmatpush.bf16.msrb.mxu2 %v2372_v25  ;;  %v2719_v3 = vld [vmem:[#allocation4 + $0x164] sm:$0xf]  ;;  %v2461_v6 = vld [vmem:[#allocation4 + $0x168] sm:$0xf0]  ;;  %v2729_v7 = vld [vmem:[#allocation4 + $0x1b4] sm:$0xf]  ;;  %v2344_v8 = vor.u32 %v2689_v63, %v2341_v1  ;;  %v2492_v10 = vor.u32 %v2728_v4, %v2491_v0 }
 0x296   :  { %v2501_v9 = vld [vmem:[#allocation4 + $0x1b8] sm:$0xf0]  ;;  %v2483_v31 = vld [vmem:[#allocation4 + $0x190] sm:$0xf]  ;;  %v2687_v11 = vld [vmem:[#allocation4 + $0x64] sm:$0xf]  ;;  %v2464_v16 = vor.u32 %v2719_v3, %v2461_v6 }
 0x297   :  { %1523 = vmatpush.bf16.msrb.mxu3 %v2436_v30  ;;  %v2333_v12 = vld [vmem:[#allocation4 + $0x68] sm:$0xf0]  ;;  %v2504_v13 = vor.u32 %v2729_v7, %v2501_v9  ;;  %v2726_v14 = vld [vmem:[#allocation4 + $0x194] sm:$0xf0]  ;;  %v2727_v17 = vld [vmem:[#allocation4 + $0x1a4] sm:$0xf] }
 0x298   :  { %1497 = vmatpush.bf16.msrb.mxu1 %v2308_v34  ;;  %v2493_v18 = vld [vmem:[#allocation4 + $0x1a8] sm:$0xf0]  ;;  %v2717_v19 = vld [vmem:[#allocation4 + $0x154] sm:$0xf]  ;;  %v2453_v20 = vld [vmem:[#allocation4 + $0x158] sm:$0xf0]  ;;  %v2336_v23 = vor.u32 %v2687_v11, %v2333_v12  ;;  %v2484_v25 = vor.u32 %v2726_v14, %v2483_v31 }
 0x299   :  { %1511 = vmatpush.bf16.msrb.mxu2 %v2364_v35  ;;  %v2475_v21 = vld [vmem:[#allocation4 + $0x180] sm:$0xf]  ;;  %v2724_v26 = vld [vmem:[#allocation4 + $0x184] sm:$0xf0]  ;;  %v2685_v27 = vld [vmem:[#allocation4 + $0x54] sm:$0xf]  ;;  %1588 = vmatpush.bf16.msra.mxu0 %v2504_v13  ;;  %v2496_v29 = vor.u32 %v2727_v17, %v2493_v18  ;;  %v2456_v32 = vor.u32 %v2717_v19, %v2453_v20 }
 0x29a   :  { %v2325_v28 = vld [vmem:[#allocation4 + $0x58] sm:$0xf0]  ;;  %v2705_v30 = vld [vmem:[#allocation4 + $0xf4] sm:$0xf]  ;;  %v2715_v36 = vld [vmem:[#allocation4 + $0x144] sm:$0xf]  ;;  %v2476_v40 = vor.u32 %v2724_v26, %v2475_v21 }
 0x29b   :  { %1524 = vmatpush.bf16.msrb.mxu3 %v2428_v41  ;;  %v2725_v33 = vld [vmem:[#allocation4 + $0x194] sm:$0xf]  ;;  %v2485_v34 = vld [vmem:[#allocation4 + $0x198] sm:$0xf0]  ;;  %v2445_v37 = vld [vmem:[#allocation4 + $0x148] sm:$0xf0]  ;;  %v2328_v38 = vor.u32 %v2685_v27, %v2325_v28 }
 0x29c   :  { %1498 = vmatpush.bf16.msrb.mxu1 %v2300_v45  ;;  %v2405_v35 = vld [vmem:[#allocation4 + $0xf8] sm:$0xf0]  ;;  %v2683_v41 = vld [vmem:[#allocation4 + $0x44] sm:$0xf]  ;;  %v2317_v42 = vld [vmem:[#allocation4 + $0x48] sm:$0xf0]  ;;  %v2488_v43 = vor.u32 %v2725_v33, %v2485_v34  ;;  %v2448_v46 = vor.u32 %v2715_v36, %v2445_v37 }
 0x29d   :  { %1512 = vmatpush.bf16.msrb.mxu2 %v2356_v24  ;;  %1589 = vmatpush.bf16.msra.mxu0 %v2496_v29  ;;  %v2408_v45 = vor.u32 %v2705_v30, %v2405_v35  ;;  %v2703_v24 = vld [vmem:[#allocation4 + $0xe4] sm:$0xf]  ;;  %v2477_v49 = vld [vmem:[#allocation4 + $0x188] sm:$0xf0]  ;;  %v2713_v51 = vld [vmem:[#allocation4 + $0x134] sm:$0xf]  ;;  %v2320_v53 = vor.u32 %v2683_v41, %v2317_v42 }
 0x29e   :  { %v2723_v48 = vld [vmem:[#allocation4 + $0x184] sm:$0xf]  ;;  %v2397_v50 = vld [vmem:[#allocation4 + $0xe8] sm:$0xf0]  ;;  %v2681_v54 = vld [vmem:[#allocation4 + $0x34] sm:$0xf] }
 0x29f   :  { %1525 = vmatpush.bf16.msrb.mxu3 %v2420_v52  ;;  %v2437_v52 = vld [vmem:[#allocation4 + $0x138] sm:$0xf0]  ;;  %v2400_v56 = vor.u32 %v2703_v24, %v2397_v50  ;;  %v2701_v57 = vld [vmem:[#allocation4 + $0xd4] sm:$0xf]  ;;  %v2711_v60 = vld [vmem:[#allocation4 + $0x124] sm:$0xf] }
 0x2a0   :  { %1499 = vmatpush.bf16.msrb.mxu1 %v2292_v55  ;;  %v2309_v15 = vld [vmem:[#allocation4 + $0x38] sm:$0xf0]  ;;  %v2480_v55 = vor.u32 %v2723_v48, %v2477_v49  ;;  %v2679_v63 = vld [vmem:[#allocation4 + $0x24] sm:$0xf]  ;;  %v2301_v1 = vld [vmem:[#allocation4 + $0x28] sm:$0xf0] }
 0x2a1   :  { %1513 = vmatpush.bf16.msrb.mxu2 %v2348_v58  ;;  %1590 = vmatpush.bf16.msra.mxu0 %v2488_v43  ;;  %v2440_v58 = vor.u32 %v2713_v51, %v2437_v52  ;;  %v2389_v59 = vld [vmem:[#allocation4 + $0xd8] sm:$0xf0]  ;;  %v2699_v4 = vld [vmem:[#allocation4 + $0xc4] sm:$0xf]  ;;  %v2709_v3 = vld [vmem:[#allocation4 + $0x114] sm:$0xf]  ;;  %v2304_v7 = vor.u32 %v2679_v63, %v2301_v1  ;;  %v1597_v63 = vlaneseq }
 0x2a2   :  { %v2392_v0 = vor.u32 %v2701_v57, %v2389_v59  ;;  %v2421_v6 = vld [vmem:[#allocation4 + $0x118] sm:$0xf0]  ;;  %v2697_v31 = vld [vmem:[#allocation4 + $0xb4] sm:$0xf]  ;;  %v2707_v13 = vld [vmem:[#allocation4 + $0x104] sm:$0xf] }
 0x2a3   :  { %1526 = vmatpush.bf16.msrb.mxu3 %v2412_v62  ;;  %v2312_v62 = vor.u32 %v2681_v54, %v2309_v15  ;;  %v2293_v9 = vld [vmem:[#allocation4 + $0x18] sm:$0xf0]  ;;  %v2424_v11 = vor.u32 %v2709_v3, %v2421_v6  ;;  %v2413_v14 = vld [vmem:[#allocation4 + $0x108] sm:$0xf0]  ;;  %v2675_v17 = vld [vmem:[#allocation4 + $0x4] sm:$0xf] }
 0x2a4   :  { %1514 = vmatmul.bf16.vlgmr.msrb.gmra.mxu2 %v3043_v22  ;;  %1500 = vmatpush.bf16.msrb.mxu1 %v2284_v2  ;;  %v2381_v2 = vld [vmem:[#allocation4 + $0xc8] sm:$0xf0]  ;;  %v2373_v12 = vld [vmem:[#allocation4 + $0xb8] sm:$0xf0]  ;;  %v2416_v20 = vor.u32 %v2707_v13, %v2413_v14  ;;  %v2695_v21 = vld [vmem:[#allocation4 + $0xa4] sm:$0xf] }
 0x2a5   :  { %1536 = vmatpush.bf16.msra.mxu2 %v2500_v61  ;;  %v2429_v61 = vld [vmem:[#allocation4 + $0x128] sm:$0xf0]  ;;  %1591 = vmatpush.bf16.msra.mxu0 %v2480_v55  ;;  %v2376_v19 = vor.u32 %v2697_v31, %v2373_v12  ;;  %v2693_v26 = vld [vmem:[#allocation4 + $0x94] sm:$0xf]  ;;  %v2357_v27 = vld [vmem:[#allocation4 + $0x98] sm:$0xf0] }
 0x2a6   :  { %1527 = vmatmul.bf16.vlgmr.msrb.gmra.mxu3 %v3045_v39  ;;  %v2285_v18 = vld [vmem:[#allocation4 + $0x8] sm:$0xf0]  ;;  %v2360_v28 = vor.u32 %v2693_v26, %v2357_v27  ;;  %v2691_v29 = vld [vmem:[#allocation4 + $0x84] sm:$0xf] }
 0x2a7   :  { %1571 = vmatpush.bf16.msra.mxu3 %v2472_v5  ;;  %1501 = vmatmul.bf16.vlgmr.msrb.gmra.mxu1 %v3050_v47  ;;  %v2432_v5 = vor.u32 %v2711_v60, %v2429_v61  ;;  %v2349_v30 = vld [vmem:[#allocation4 + $0x88] sm:$0xf0]  ;;  %v1204_v33 = vld [vmem:[#allocation11 + $0xd] sm:$0x3] }
 0x2a8   :  { %1545 = vmatpush.bf16.msra.mxu1 %v2344_v8  ;;  %2506 = vmatmul.msk.bf16.vlgmr.msra.gmra.mxu0 %vm1134_vm9, %v3048_v44  ;;  %v2677_v8 = vld [vmem:[#allocation4 + $0x14] sm:$0xf]  ;;  %v1206_v34 = vperm.slane %v1204_v33, 0 }
 0x2a9   :  { %1537 = vmatpush.bf16.msra.mxu2 %v2492_v10  ;;  %v2384_v10 = vor.u32 %v2699_v4, %v2381_v2 }
 0x2ab   :  { %1572 = vmatpush.bf16.msra.mxu3 %v2464_v16  ;;  %v2296_v16 = vor.u32 %v2677_v8, %v2293_v9 }
 0x2ac   :  { %1546 = vmatpush.bf16.msra.mxu1 %v2336_v23  ;;  %v2288_v23 = vor.u32 %v2675_v17, %v2285_v18 }
 0x2ad   :  { %1538 = vmatpush.bf16.msra.mxu2 %v2484_v25 }
 0x2af   :  { %1573 = vmatpush.bf16.msra.mxu3 %v2456_v32  ;;  %v2352_v32 = vor.u32 %v2691_v29, %v2349_v30 }
 0x2b0   :  { %1547 = vmatpush.bf16.msra.mxu1 %v2328_v38 }
 0x2b1   :  { %1539 = vmatpush.bf16.msra.mxu2 %v2476_v40 }
 0x2b3   :  { %1574 = vmatpush.bf16.msra.mxu3 %v2448_v46 }
 0x2b4   :  { %1548 = vmatpush.bf16.msra.mxu1 %v2320_v53  ;;  %2505 = vmatmul.msk.bf16.vlgmr.msra.gmra.mxu2 %vm1134_vm9, %v3048_v44  ;;  %v2365_v44 = vld [vmem:[#allocation4 + $0xa8] sm:$0xf0]  ;;  %v1207_v53 = vperm.slane %v1204_v33, 1 }
 0x2b5   :  { %1558 = vmatpush.bf16.msrb.mxu2 %v2408_v45  ;;  %v2368_v25 = vor.u32 %v2695_v21, %v2365_v44 }
 0x2b7   :  { %1575 = vmatpush.bf16.msra.mxu3 %v2440_v58 }
 0x2b8   :  { %1549 = vmatpush.bf16.msra.mxu1 %v2312_v62 }
 0x2b9   :  { %1559 = vmatpush.bf16.msrb.mxu2 %v2400_v56 }
 0x2bb   :  { %1576 = vmatpush.bf16.msra.mxu3 %v2432_v5 }
 0x2bc   :  { %1550 = vmatpush.bf16.msra.mxu1 %v2304_v7 }
 0x2bd   :  { %1560 = vmatpush.bf16.msrb.mxu2 %v2392_v0  ;;  %v3064_v0 = vand.u32 127, %v1597_v63 }
 0x2bf   :  { %1577 = vmatpush.bf16.msra.mxu3 %v2424_v11  ;;  %v1599_v2 = vadd.s32 128, %v3064_v0 }
 0x2c0   :  { %1551 = vmatpush.bf16.msra.mxu1 %v2296_v16 }
 0x2c1   :  { %1561 = vmatpush.bf16.msrb.mxu2 %v2384_v10  ;;  %vm1601_vm14 = vcmp.lt.s32.totalorder %v1599_v2, 192 }
 0x2c3   :  { %1578 = vmatpush.bf16.msra.mxu3 %v2416_v20 }
 0x2c4   :  { %1552 = vmatpush.bf16.msra.mxu1 %v2288_v23 }
 0x2c5   :  { %1562 = vmatpush.bf16.msrb.mxu2 %v2376_v19 }
 0x2c6   :  { %1579 = vmatmul.bf16.vlgmr.msra.gmra.mxu3 %v3045_v39 }
 0x2c7   :  { %1553 = vmatmul.bf16.vlgmr.msra.gmra.mxu1 %v3050_v47 }
 0x2c9   :  { %1563 = vmatpush.bf16.msrb.mxu2 %v2368_v25 }
 0x2cd   :  { %1564 = vmatpush.bf16.msrb.mxu2 %v2360_v28 }
 0x2d1   :  { %1565 = vmatpush.bf16.msrb.mxu2 %v2352_v32 }
 0x2d4   :  { %1566 = vmatmul.bf16.vlgmr.msrb.gmra.mxu2 %v3043_v22 }
 0x324   :  { %v1502_v35 = vpop.f32.mrf.mxu1 }
 0x325   :  { %v1503_v36 = vadd.f32 %v1502_v35, %v1206_v34  ;;  %v1593_v45 = vpop.f32.mrf.mxu0 }
 0x327   :  { %v1515_v37 = vpop.f32.mrf.mxu2 }
 0x328   :  { %v1516_v38 = vadd.f32 %v1515_v37, %v1503_v36 }
 0x329   :  { %v1528_v40 = vpop.f32.mrf.mxu3 }
 0x32a   :  { %v1529_v41 = vadd.f32 %v1528_v40, %v1516_v38 }
 0x32c   :  { %v1504_v39 = vpop.f32.mrf.mxu1 }
 0x32d   :  { %v1595_v48 = vpop.f32.mrf.mxu0 }
 0x32f   :  { %v1517_v42 = vpop.f32.mrf.mxu2 }
 0x331   :  { %v1530_v43 = vpop.f32.mrf.mxu3 }
 0x337   :  { %v1541_v47 = vpop.f32.mrf.mxu2 }
 0x338   :  { %v1542_v24 = vadd.f32 %v1541_v47, %v1529_v41 }
 0x33a   :  { %v1602_v46 = vmax.f32 %v1542_v24, 0.0 }
 0x33c   :  { %v3062_v49 = vpack.c.bf16 %v1602_v46, %v1602_v46 }
 0x33f   :  { %v1543_v50 = vpop.f32.mrf.mxu2 }
 0x344   :  { %v1554_v22 = vpop.f32.mrf.mxu1 }
 0x345   :  { %v1555_v15 = vadd.f32 %v1554_v22, %v1207_v53 }
 0x349   :  { %v1580_v51 = vpop.f32.mrf.mxu3 }
 0x34c   :  { %v1556_v52 = vpop.f32.mrf.mxu1 }
 0x351   :  { %v1582_v54 = vpop.f32.mrf.mxu3 }
 0x357   :  { %v1567_v55 = vpop.f32.mrf.mxu2 }
 0x358   :  { %v1568_v56 = vadd.f32 %v1567_v55, %v1555_v15 }
 0x35a   :  { %v1581_v57 = vadd.f32 %v1580_v51, %v1568_v56 }
 0x35c   :  { %v1594_v58 = vadd.f32 %v1593_v45, %v1581_v57 }
 0x35e   :  { %v2508_v59 = vmul.f32 -1.442695, %v1594_v58  ;;  %v1603_v10 = vmax.f32 %v1594_v58, 0.0 }
 0x35f   :  { %v1569_v60 = vpop.f32.mrf.mxu2 }
 0x360   :  { %2768 = vpow2.f32 %v2508_v59 }
 0x366   :  { %v2769_v61 = vpop.eup %2768 }
 0x367   :  { %v1611_v62 = vadd.f32 1.0, %v2769_v61 }
 0x369   :  { %2770 = vrcp.f32 %v1611_v62  ;;  %v1638_v3 = vand.u32 2147483648, %v1611_v62  ;;  %v1636_v7 = vand.u32 2147483647, %v1611_v62  ;;  %vm1632_vm13 = vweird.f32 %v1611_v62 }
 0x36b   :  { %v1639_v9 = vor.u32 1.1754944e-38, %v1638_v3  ;;  %vm1637_vm0 = vcmp.eq.f32.partialorder %v1636_v7, 8.507059e+37 }
 0x36f   :  { %v2771_v1 = vpop.eup %2770 }
 0x370   :  { %v1628_v4 = vmul.f32 %v2771_v1, %v1611_v62  ;;  %vm1633_vm12 = vweird.f32 %v2771_v1 }
 0x371   :  { %vm1634_vm15 = vmor %vm1632_vm13, %vm1633_vm12 }
 0x372   :  { %v1629_v5 = vsub.f32 1.0, %v1628_v4 }
 0x374   :  { %v1630_v6 = vmul.f32 %v2771_v1, %v1629_v5 }
 0x376   :  { %v1631_v8 = vadd.f32 %v2771_v1, %v1630_v6 }
 0x378   :  { %v1635_v31 = vsel %vm1634_vm15, %v2771_v1, %v1631_v8 }
 0x379   :  { %v1640_v11 = vsel %vm1637_vm0, %v1639_v9, %v1635_v31 }
 0x37a   :  { %v1643_v12 = vsel %vm1601_vm14, %v1603_v10, %v1640_v11 }
 0x37b   :  { %v1645_v13 = vpack.c.bf16 %v1643_v12, %v1643_v12 }
 0x37c   :  { %2955 = dma.done.wait [#allocation7 + $0x3], 1792 }
 0x37d   :  { %2956 = vsyncadd [#allocation7 + $0x3], 4294965504  ;;  %v2738_v14 = vld [vmem:[#allocation5 + $0x38] sm:$0xff]  ;;  %v2744_v16 = vld [vmem:[#allocation5 + $0x68] sm:$0xff]  ;;  %vm1766_vm1 = vcmask 785408   ;;  %s2967_s23 = smov [#allocation13]  }
 0x37e   :  { %1770 = vmatpush.bf16.msrb.mxu0 %v2738_v14  ;;  %1785 = vmatpush.bf16.msrb.mxu1 %v2744_v16  ;;  %v2737_v17 = vld [vmem:[#allocation5 + $0x30] sm:$0xff]  ;;  %v2743_v18 = vld [vmem:[#allocation5 + $0x60] sm:$0xff]  ;;  %v2736_v19 = vld [vmem:[#allocation5 + $0x28] sm:$0xff]  ;;  %s1823_s24 = sshll.u32 %s2967_s23, 4  ;;  %s1825_s27 = sshll.u32 %s3078_s6, 4  ;;  %vm1796_vm4 = vcmp.eq.s32.totalorder %v3064_v0, 40  ;;  %s1824_s24 = int_to_ptr.vmem [resolvable:$true] %s1823_s24  ;;  %s1826_s27 = int_to_ptr.hbm [resolvable:$true] %s1825_s27 }
 0x37f   :  { %v2742_v20 = vld [vmem:[#allocation5 + $0x58] sm:$0xff]  ;;  %v2735_v21 = vld [vmem:[#allocation5 + $0x20] sm:$0xff]  ;;  %v2741_v44 = vld [vmem:[#allocation5 + $0x50] sm:$0xff] }
 0x380   :  { %v2734_v23 = vld [vmem:[#allocation5 + $0x18] sm:$0xff]  ;;  %v2740_v25 = vld [vmem:[#allocation5 + $0x48] sm:$0xff]  ;;  %v2733_v26 = vld [vmem:[#allocation5 + $0x10] sm:$0xff] }
 0x381   :  { %v2739_v27 = vld [vmem:[#allocation5 + $0x40] sm:$0xff]  ;;  %v2732_v28 = vld [vmem:[#allocation5 + $0x8] sm:$0xff] }
 0x382   :  { %1771 = vmatpush.bf16.msrb.mxu0 %v2737_v17  ;;  %1786 = vmatpush.bf16.msrb.mxu1 %v2743_v18  ;;  %v2731_v29 = vld [vmem:[#allocation5] sm:$0xff] }
 0x383   :  { %v2772_v32 = vld [vmem:[#allocation11 + $0xf] ss:$0 sm:$0xff] }
 0x386   :  { %1772 = vmatpush.bf16.msrb.mxu0 %v2736_v19  ;;  %1787 = vmatpush.bf16.msrb.mxu1 %v2742_v20 }
 0x38a   :  { %1773 = vmatpush.bf16.msrb.mxu0 %v2735_v21  ;;  %1788 = vmatpush.bf16.msrb.mxu1 %v2741_v44 }
 0x38e   :  { %1774 = vmatpush.bf16.msrb.mxu0 %v2734_v23  ;;  %1789 = vmatpush.bf16.msrb.mxu1 %v2740_v25 }
 0x392   :  { %1775 = vmatpush.bf16.msrb.mxu0 %v2733_v26  ;;  %1790 = vmatpush.bf16.msrb.mxu1 %v2739_v27 }
 0x395   :  { %2565 = vmatmul.msk.bf16.vlgmr.msrb.gmra.mxu1 %vm1766_vm1, %v1645_v13 }
 0x396   :  { %1776 = vmatpush.bf16.msrb.mxu0 %v2732_v28 }
 0x39a   :  { %1777 = vmatpush.bf16.msrb.mxu0 %v2731_v29 }
 0x39d   :  { %1778 = vmatmul.bf16.vlgmr.msrb.gmra.mxu0 %v3062_v49 }
 0x412   :  { %v1792_v30 = vpop.f32.mrf.mxu1 }
 0x41a   :  { %v1779_v33 = vpop.f32.mrf.mxu0  ;;  %v1794_v34 = vpop.f32.mrf.mxu1 }
 0x41b   :  { %v1780_v35 = vadd.f32 %v2772_v32, %v1779_v33 }
 0x41d   :  { %v1793_v36 = vadd.f32 %v1792_v30, %v1780_v35 }
 0x41f   :  { %v2566_v37 = vmul.f32 -1.442695, %v1793_v36 }
 0x421   :  { %2773 = vpow2.f32 %v2566_v37 }
 0x422   :  { %v1781_v38 = vpop.f32.mrf.mxu0 }
 0x427   :  { %v2774_v40 = vpop.eup %2773 }
 0x428   :  { %v1800_v41 = vadd.f32 1.0, %v2774_v40 }
 0x42a   :  { %2775 = vrcp.f32 %v1800_v41  ;;  %v1812_v45 = vand.u32 2147483648, %v1800_v41  ;;  %v1810_v24 = vand.u32 2147483647, %v1800_v41  ;;  %vm1806_vm3 = vweird.f32 %v1800_v41 }
 0x42c   :  { %v1813_v48 = vor.u32 1.1754944e-38, %v1812_v45  ;;  %vm1811_vm6 = vcmp.eq.f32.partialorder %v1810_v24, 8.507059e+37 }
 0x430   :  { %v2776_v39 = vpop.eup %2775 }
 0x431   :  { %v1802_v42 = vmul.f32 %v2776_v39, %v1800_v41  ;;  %vm1807_vm2 = vweird.f32 %v2776_v39 }
 0x432   :  { %vm1808_vm5 = vmor %vm1806_vm3, %vm1807_vm2 }
 0x433   :  { %v1803_v43 = vsub.f32 1.0, %v1802_v42 }
 0x435   :  { %v1804_v47 = vmul.f32 %v2776_v39, %v1803_v43 }
 0x437   :  { %v1805_v46 = vadd.f32 %v2776_v39, %v1804_v47 }
 0x439   :  { %v1809_v49 = vsel %vm1808_vm5, %v2776_v39, %v1805_v46 }
 0x43a   :  { %v1814_v50 = vsel %vm1811_vm6, %v1813_v48, %v1809_v49 }
 0x43b   :  { %v1816_v22 = vsel %vm1796_vm4, %v1814_v50, %v1793_v36 }
 0x43c   :  { %1817 = vst [vmem:[#allocation13] sm:$0xff] %v1816_v22 }
 0x43d   :  { %1828 = dma.vmem_to_hbm [thread:$0]  %s1824_s24, 128, %s1826_s27, [#allocation10]  }
 0x43e   :  { %2957 = dma.done.wait [#allocation10], 128  }
 0x43f   :  { %2958 = vsyncadd [#allocation10], 4294967168 }
 0x440   :  { %1833 = vsyncpa [#allocation9], 1 }
 0x441   :  { %1834 = vsyncpa [#allocation12], 1 }
 0x442   :  { %1835 = vsyncpa [#allocation10], 1 }
 0x443   :  { %1836 = vsyncmov [#allocation7] }
 0x446   :  { %s1837_s28 = vpop.sfrf %1836 }
 0x447   :  { %p2567_p0 = scmp.ne.s32.totalorder %s1837_s28, 0 }
 0x449   :  { %1841 = shalt.err (%p2567_p0)  }
 0x44a   :  { %1843 = vsyncmov [#allocation7 + $0x1] }
 0x44d   :  { %s1844_s6 = vpop.sfrf %1843 }
 0x44e   :  { %p2568_p1 = scmp.ne.s32.totalorder %s1844_s6, 0 }
 0x450   :  { %1848 = shalt.err (%p2568_p1)  }
 0x451   :  { %1850 = vsyncmov [#allocation7 + $0x2] }
 0x454   :  { %s1851_s29 = vpop.sfrf %1850 }
 0x455   :  { %p2569_p2 = scmp.ne.s32.totalorder %s1851_s29, 0 }
 0x457   :  { %1855 = shalt.err (%p2569_p2)  }
 0x458   :  { %1857 = vsyncmov [#allocation7 + $0x3] }
 0x45b   :  { %s1858_s30 = vpop.sfrf %1857 }
 0x45c   :  { %p2570_p3 = scmp.ne.s32.totalorder %s1858_s30, 0 }
 0x45e   :  { %1862 = shalt.err (%p2570_p3)  }

</bundles_post_ra>
